<compile_context>
chip_gen: v5e
topology: v5e:2x2
jax: 0.10.0
libtpu: 0.0.40
codegen_flags: <defaults>
</compile_context>

<pallas_src>
import functools

import jax
import jax.numpy as jnp
from jax import lax
from jax.experimental import pallas as pl
from jax.experimental.pallas import tpu as pltpu

_LANE = 128  # vreg lane width


def _round_up(v, m):
    return ((v + m - 1) // m) * m


def _vmem_capacity_bytes():
    """Physical VMEM of the current chip; conservative fallback if unqueryable."""
    try:
        return int(pltpu.get_tpu_info().vmem_capacity_bytes)
    except Exception:
        return 64 * 1024 * 1024  # assume the smallest (v7x) if we cannot query


def _plan(n, force_streamed=False):
    """Per-generation tiling plan -> (tm, n_pad, vmem_limit_bytes, fused)."""
    vmem = _vmem_capacity_bytes()
    if vmem >= 100 * 1024 * 1024:      # v5e / v6e: 128 MiB physical VMEM
        vmem_limit = 96 * 1024 * 1024
        tm_target = 512
    else:                              # v7x: 64 MiB physical VMEM, 3.2 TB/s HBM
        vmem_limit = 46 * 1024 * 1024
        tm_target = 256

    if not force_streamed:
        # Fused single-call path when bf16 A (double-buffered input block) plus
        # f32 temporaries / output fit comfortably under the budget.
        n_pad = _round_up(max(n, 1), _LANE)
        fused_bytes = 4 * n_pad * n_pad + 64 * _LANE * n_pad
        if fused_bytes <= int(0.7 * vmem_limit):
            return 0, n_pad, vmem_limit, True

    # Streamed path: row tile must be a multiple of 16 (native bf16 sublane tile).
    tm = min(tm_target, _round_up(max(n, 16), 16))
    n_pad = _round_up(n, tm)
    return tm, n_pad, vmem_limit, False


def prepare_adjacency(a_hat, force_streamed=False):
    """Pad + cast the dense normalized adjacency to bf16 ONCE (outside hot path).

    Returns (a_pad, n, tm, vmem_limit, fused).
    Invariant: rows/columns >= n of a_pad are exactly zero — the streamed and
    fused kernels rely on this to neutralize padded-row garbage in HW2.
    """
    n = a_hat.shape[0]
    tm, n_pad, vmem_limit, fused = _plan(n, force_streamed=force_streamed)
    a_pad = jnp.zeros((n_pad, n_pad), jnp.bfloat16)
    a_pad = a_pad.at[:n, :n].set(a_hat.astype(jnp.bfloat16))
    return a_pad, n, tm, vmem_limit, fused


# ---------------------------------------------------------------------------
# Kernels
# ---------------------------------------------------------------------------
def _masked_log_softmax(z, num_classes):
    """log_softmax over the first num_classes lanes of a lane-padded f32 tile."""
    col = lax.broadcasted_iota(jnp.int32, z.shape, 1)
    z = jnp.where(col < num_classes, z, -1e30)
    m = jnp.max(z, axis=1, keepdims=True)
    zs = z - m
    lse = jnp.log(jnp.sum(jnp.exp(zs), axis=1, keepdims=True))
    return zs - lse


def _fused_kernel(a_ref, xw1_ref, b1_ref, w2_ref, b2_ref, o_ref, *, num_classes):
    """Whole forward in one call (A resident in VMEM): small/medium graphs."""
    a = a_ref[...]                                                   # (Np, Np) bf16
    h1 = jnp.maximum(
        jnp.dot(a, xw1_ref[...], preferred_element_type=jnp.float32) + b1_ref[...],
        0.0)                                                         # (Np, Hp) f32
    hw2 = jnp.dot(h1.astype(jnp.bfloat16), w2_ref[...],
                  preferred_element_type=jnp.float32)                # (Np, Cp) f32
    z = jnp.dot(a, hw2.astype(jnp.bfloat16),
                preferred_element_type=jnp.float32) + b2_ref[...]    # (Np, Cp) f32
    o_ref[...] = _masked_log_softmax(z, num_classes)


def _agg1_kernel(a_ref, xw1_ref, b1_ref, w2_ref, o_ref):
    """HW2[tile] = relu(A[tile] @ XW1 + b1) @ W2 (streamed A row tile)."""
    h = jnp.dot(a_ref[...], xw1_ref[...], preferred_element_type=jnp.float32)
    h = jnp.maximum(h + b1_ref[...], 0.0)
    o_ref[...] = jnp.dot(
        h.astype(jnp.bfloat16), w2_ref[...], preferred_element_type=jnp.float32
    ).astype(o_ref.dtype)


def _agg2_kernel(a_ref, hw2_ref, b2_ref, o_ref, *, num_classes):
    """out[tile] = log_softmax(A[tile] @ HW2 + b2) (streamed A row tile)."""
    z = jnp.dot(a_ref[...], hw2_ref[...], preferred_element_type=jnp.float32)
    z = z + b2_ref[...]
    o_ref[...] = _masked_log_softmax(z, num_classes)


# ---------------------------------------------------------------------------
# Forward wrapper (hot path — expects the pre-padded bf16 adjacency)
# ---------------------------------------------------------------------------
def gcn_forward(a_pad, num_nodes, x, w1, b1, w2, b2, *, tm, vmem_limit, fused):
    n = num_nodes
    n_pad = a_pad.shape[0]
    hidden = w1.shape[1]
    n_cls = w2.shape[1]
    h_pad = _round_up(hidden, _LANE)
    c_pad = _round_up(n_cls, _LANE)

    # Thin-K feature transform in plain JAX (K = num_features is tiny; an MXU
    # kernel wastes >90% of the array, plus a launch and an HBM round trip).
    xw1 = x.astype(jnp.float32) @ w1.astype(jnp.float32)            # (n, hidden) f32
    xw1_p = jnp.zeros((n_pad, h_pad), jnp.bfloat16)
    xw1_p = xw1_p.at[:n, :hidden].set(xw1.astype(jnp.bfloat16))

    b1_p = jnp.zeros((1, h_pad), jnp.float32).at[:, :hidden].set(
        b1.reshape(1, -1).astype(jnp.float32))
    w2_p = jnp.zeros((h_pad, c_pad), jnp.bfloat16).at[:hidden, :n_cls].set(
        w2.astype(jnp.bfloat16))
    b2_p = jnp.zeros((1, c_pad), jnp.float32).at[:, :n_cls].set(
        b2.reshape(1, -1).astype(jnp.float32))

    if fused:
        out_p = pl.pallas_call(
            functools.partial(_fused_kernel, num_classes=n_cls),
            out_shape=jax.ShapeDtypeStruct((n_pad, c_pad), jnp.float32),
            grid=(1,),
            in_specs=[
                pl.BlockSpec((n_pad, n_pad), lambda i: (0, 0)),   # A (read once)
                pl.BlockSpec((n_pad, h_pad), lambda i: (0, 0)),   # XW1
                pl.BlockSpec((1, h_pad), lambda i: (0, 0)),       # b1
                pl.BlockSpec((h_pad, c_pad), lambda i: (0, 0)),   # W2
                pl.BlockSpec((1, c_pad), lambda i: (0, 0)),       # b2
            ],
            out_specs=pl.BlockSpec((n_pad, c_pad), lambda i: (0, 0)),
            compiler_params=pltpu.CompilerParams(
                dimension_semantics=("arbitrary",),
                vmem_limit_bytes=vmem_limit),
        )(a_pad, xw1_p, b1_p, w2_p, b2_p)
        return out_p[:n, :n_cls]

    # ---- streamed path: two row-tiled passes over A ----
    grid = (n_pad // tm,)
    cparams = pltpu.CompilerParams(
        dimension_semantics=("parallel",),     # shard row tiles across v7x TCs
        vmem_limit_bytes=vmem_limit)
    single = pl.Buffered(1)                    # grid-invariant operands: 1 buffer

    # pass 1: HW2 = relu(A @ XW1 + b1) @ W2   (A streamed, pipelined row tiles)
    hw2 = pl.pallas_call(
        _agg1_kernel,
        out_shape=jax.ShapeDtypeStruct((n_pad, c_pad), jnp.bfloat16),
        grid=grid,
        in_specs=[
            pl.BlockSpec((tm, n_pad), lambda i: (i, 0)),                            # A tile
            pl.BlockSpec((n_pad, h_pad), lambda i: (0, 0), pipeline_mode=single),   # XW1
            pl.BlockSpec((1, h_pad), lambda i: (0, 0), pipeline_mode=single),       # b1
            pl.BlockSpec((h_pad, c_pad), lambda i: (0, 0), pipeline_mode=single),   # W2
        ],
        out_specs=pl.BlockSpec((tm, c_pad), lambda i: (i, 0)),
        compiler_params=cparams,
    )(a_pad, xw1_p, b1_p, w2_p)

    # pass 2: out = log_softmax(A @ HW2 + b2)
    out_p = pl.pallas_call(
        functools.partial(_agg2_kernel, num_classes=n_cls),
        out_shape=jax.ShapeDtypeStruct((n_pad, c_pad), jnp.float32),
        grid=grid,
        in_specs=[
            pl.BlockSpec((tm, n_pad), lambda i: (i, 0)),                            # A tile
            pl.BlockSpec((n_pad, c_pad), lambda i: (0, 0), pipeline_mode=single),   # HW2
            pl.BlockSpec((1, c_pad), lambda i: (0, 0), pipeline_mode=single),       # b2
        ],
        out_specs=pl.BlockSpec((tm, c_pad), lambda i: (i, 0)),
        compiler_params=cparams,
    )(a_pad, hw2, b2_p)

    return out_p[:n, :n_cls]


# ---------------------------------------------------------------------------
# Plain-JAX glue: dense normalized adjacency + reference + init
# ---------------------------------------------------------------------------
def build_normalized_adjacency(edge_index, num_nodes):
    """Dense D^{-1/2}(A+I)D^{-1/2} from a (2, E) edge_index (preprocessing)."""
    src, dst = edge_index[0], edge_index[1]
    a = jnp.zeros((num_nodes, num_nodes), jnp.float32)
    a = a.at[src, dst].set(1.0)
    a = a.at[dst, src].set(1.0)                    # undirected
    a = a + jnp.eye(num_nodes, dtype=jnp.float32)  # self-loops
    deg = jnp.sum(a, axis=1)
    d_inv_sqrt = jnp.where(deg > 0, 1.0 / jnp.sqrt(deg), 0.0)
    return a * d_inv_sqrt[:, None] * d_inv_sqrt[None, :]


def gcn_reference(a_hat, x, w1, b1, w2, b2):
    h1 = jnp.maximum(a_hat @ (x @ w1) + b1, 0.0)
    z = a_hat @ (h1 @ w2) + b2
    return jax.nn.log_softmax(z, axis=1)


def glorot(key, shape):
    fan_in, fan_out = shape
    limit = (6.0 / (fan_in + fan_out)) ** 0.5
    return jax.random.uniform(key, shape, jnp.float32, -limit, limit)


if __name__ == "__main__":
    # Module-consistent small shapes: N nodes, num_features=8, hidden_dim=16, 4 classes.
    N, F_IN, HIDDEN, C = 200, 8, 16, 4

    key = jax.random.PRNGKey(0)
    k_x, k_w1, k_w2, k_b1, k_b2, k_e = jax.random.split(key, 6)

    # Node features (data.x)
    x = jax.random.normal(k_x, (N, F_IN), jnp.float32)

    # Simple deterministic graph: ring + random chords (data.edge_index)
    ring_src = jnp.arange(N, dtype=jnp.int32)
    ring_dst = (ring_src + 1) % N
    chord_src = jax.random.randint(k_e, (N // 2,), 0, N, dtype=jnp.int32)
    chord_dst = (chord_src + N // 3) % N
    edge_index = jnp.stack(
        [jnp.concatenate([ring_src, chord_src]),
         jnp.concatenate([ring_dst, chord_dst])], axis=0)

    a_hat = build_normalized_adjacency(edge_index, N)

    # GCNConv parameters (glorot weights; nonzero biases to stress the
    # padded-row invariant).
    w1 = glorot(k_w1, (F_IN, HIDDEN))
    b1 = 0.1 * jax.random.normal(k_b1, (1, HIDDEN), jnp.float32)
    w2 = glorot(k_w2, (HIDDEN, C))
    b2 = 0.1 * jax.random.normal(k_b2, (1, C), jnp.float32)

    ref = gcn_reference(a_hat, x, w1, b1, w2, b2)

    # --- fused single-call path (A fits VMEM at this size) ---
    a_pad, n, tm, vmem_limit, fused = prepare_adjacency(a_hat)
    out = gcn_forward(a_pad, n, x, w1, b1, w2, b2,
                      tm=tm, vmem_limit=vmem_limit, fused=fused)
    jax.block_until_ready(out)
    assert out.shape == (N, C)
    assert bool(jnp.all(jnp.abs(jnp.sum(jnp.exp(out), axis=1) - 1.0) < 1e-3))
    assert bool(jnp.max(jnp.abs(out - ref)) < 0.15), float(jnp.max(jnp.abs(out - ref)))

    # --- streamed row-tiled path (what large graphs take), forced at demo size ---
    a_pad_s, n_s, tm_s, vmem_s, fused_s = prepare_adjacency(a_hat, force_streamed=True)
    out_s = gcn_forward(a_pad_s, n_s, x, w1, b1, w2, b2,
                        tm=tm_s, vmem_limit=vmem_s, fused=fused_s)
    jax.block_until_ready(out_s)
    assert out_s.shape == (N, C)
    assert bool(jnp.max(jnp.abs(out_s - ref)) < 0.15), float(jnp.max(jnp.abs(out_s - ref)))

    print("KERNEL_OK")
</pallas_src>

<mosaic_0001>
module attributes {stable_mosaic.version = 11 : i64} {
  func.func @_fused_kernel(%arg0: i32, %arg1: memref<256x256xbf16, #tpu.memory_space<vmem>>, %arg2: memref<256x128xbf16, #tpu.memory_space<vmem>>, %arg3: memref<1x128xf32, #tpu.memory_space<vmem>>, %arg4: memref<128x128xbf16, #tpu.memory_space<vmem>>, %arg5: memref<1x128xf32, #tpu.memory_space<vmem>>, %arg6: memref<256x128xf32, #tpu.memory_space<vmem>>) attributes {dimension_semantics = [#tpu.dimension_semantics<arbitrary>], iteration_bounds = array<i64: 1>, scalar_prefetch = 0 : i64, scratch_operands = 0 : i64, tpu.core_type = #tpu.core_type<tc>, window_params = [{pipeline_mode = #tpu.pipeline_mode<synchronous>, transform_indices = @transform_0, window_bounds = array<i64: 256, 256>}, {pipeline_mode = #tpu.pipeline_mode<synchronous>, transform_indices = @transform_1, window_bounds = array<i64: 256, 128>}, {pipeline_mode = #tpu.pipeline_mode<synchronous>, transform_indices = @transform_2, window_bounds = array<i64: 1, 128>}, {pipeline_mode = #tpu.pipeline_mode<synchronous>, transform_indices = @transform_3, window_bounds = array<i64: 128, 128>}, {pipeline_mode = #tpu.pipeline_mode<synchronous>, transform_indices = @transform_4, window_bounds = array<i64: 1, 128>}, {pipeline_mode = #tpu.pipeline_mode<synchronous>, transform_indices = @transform_5, window_bounds = array<i64: 256, 128>}]} {
    %c0 = arith.constant 0 : index
    %c0_0 = arith.constant 0 : index
    %0 = vector.load %arg1[%c0, %c0_0] : memref<256x256xbf16, #tpu.memory_space<vmem>>, vector<256x256xbf16>
    %c0_1 = arith.constant 0 : index
    %c0_2 = arith.constant 0 : index
    %1 = vector.load %arg2[%c0_1, %c0_2] : memref<256x128xbf16, #tpu.memory_space<vmem>>, vector<256x128xbf16>
    %cst = arith.constant dense<0.000000e+00> : vector<256x128xf32>
    %2 = tpu.matmul %0, %1, %cst {dimension_numbers = #tpu.dot_dimension_numbers<[1], [0], [0], [1], [0, 0, 1, 1], [], []>} : vector<256x256xbf16>, vector<256x128xbf16>, vector<256x128xf32> -> vector<256x128xf32>
    %c0_3 = arith.constant 0 : index
    %c0_4 = arith.constant 0 : index
    %3 = vector.load %arg3[%c0_3, %c0_4] : memref<1x128xf32, #tpu.memory_space<vmem>>, vector<1x128xf32>
    %4 = vector.broadcast %3 : vector<1x128xf32> to vector<256x128xf32>
    %5 = arith.addf %2, %4 : vector<256x128xf32>
    %cst_5 = arith.constant 0.000000e+00 : f32
    %6 = vector.broadcast %cst_5 : f32 to vector<256x128xf32>
    %7 = arith.maximumf %5, %6 : vector<256x128xf32>
    %8 = arith.truncf %7 : vector<256x128xf32> to vector<256x128xbf16>
    %c0_6 = arith.constant 0 : index
    %c0_7 = arith.constant 0 : index
    %9 = vector.load %arg4[%c0_6, %c0_7] : memref<128x128xbf16, #tpu.memory_space<vmem>>, vector<128x128xbf16>
    %cst_8 = arith.constant dense<0.000000e+00> : vector<256x128xf32>
    %10 = tpu.matmul %8, %9, %cst_8 {dimension_numbers = #tpu.dot_dimension_numbers<[1], [0], [0], [1], [0, 0, 1, 1], [], []>} : vector<256x128xbf16>, vector<128x128xbf16>, vector<256x128xf32> -> vector<256x128xf32>
    %11 = arith.truncf %10 : vector<256x128xf32> to vector<256x128xbf16>
    %cst_9 = arith.constant dense<0.000000e+00> : vector<256x128xf32>
    %12 = tpu.matmul %0, %11, %cst_9 {dimension_numbers = #tpu.dot_dimension_numbers<[1], [0], [0], [1], [0, 0, 1, 1], [], []>} : vector<256x256xbf16>, vector<256x128xbf16>, vector<256x128xf32> -> vector<256x128xf32>
    %c0_10 = arith.constant 0 : index
    %c0_11 = arith.constant 0 : index
    %13 = vector.load %arg5[%c0_10, %c0_11] : memref<1x128xf32, #tpu.memory_space<vmem>>, vector<1x128xf32>
    %14 = vector.broadcast %13 : vector<1x128xf32> to vector<256x128xf32>
    %15 = arith.addf %12, %14 : vector<256x128xf32>
    %16 = tpu.iota {dimensions = array<i32: 1>} : vector<256x128xi32>
    %c4_i32 = arith.constant 4 : i32
    %17 = vector.broadcast %c4_i32 : i32 to vector<256x128xi32>
    %18 = arith.cmpi slt, %16, %17 : vector<256x128xi32>
    %cst_12 = arith.constant -1.000000e+30 : f32
    %19 = vector.broadcast %cst_12 : f32 to vector<256x128xf32>
    %20 = arith.select %18, %15, %19 : vector<256x128xi1>, vector<256x128xf32>
    %cst_13 = arith.constant dense<0xFF800000> : vector<256xf32>
    %21 = vector.multi_reduction <maximumf>, %20, %cst_13 [1] : vector<256x128xf32> to vector<256xf32>
    %22 = vector.shape_cast %21 : vector<256xf32> to vector<256x1xf32>
    %23 = vector.broadcast %22 : vector<256x1xf32> to vector<256x128xf32>
    %24 = arith.subf %20, %23 : vector<256x128xf32>
    %25 = math.exp %24 : vector<256x128xf32>
    %cst_14 = arith.constant dense<0.000000e+00> : vector<256xf32>
    %26 = vector.multi_reduction <add>, %25, %cst_14 [1] : vector<256x128xf32> to vector<256xf32>
    %27 = vector.shape_cast %26 : vector<256xf32> to vector<256x1xf32>
    %28 = math.log %27 : vector<256x1xf32>
    %29 = vector.broadcast %28 : vector<256x1xf32> to vector<256x128xf32>
    %30 = arith.subf %24, %29 : vector<256x128xf32>
    %c0_15 = arith.constant 0 : index
    %c0_16 = arith.constant 0 : index
    %31 = vector.load %arg6[%c0_15, %c0_16] : memref<256x128xf32, #tpu.memory_space<vmem>>, vector<256x128xf32>
    tpu.vector_store %arg6[%c0_15, %c0_16], %30 {strides = array<i32>} : memref<256x128xf32, #tpu.memory_space<vmem>>, vector<256x128xf32>,
    return
  }
  func.func @transform_0(%arg0: i32) -> (i32, i32) {
    %c0_i32 = arith.constant 0 : i32
    %c0_i32_0 = arith.constant 0 : i32
    %c0_i32_1 = arith.constant 0 : i32
    return %c0_i32, %c0_i32_0 : i32, i32
  }
  func.func @transform_1(%arg0: i32) -> (i32, i32) {
    %c0_i32 = arith.constant 0 : i32
    %c0_i32_0 = arith.constant 0 : i32
    %c0_i32_1 = arith.constant 0 : i32
    return %c0_i32, %c0_i32_0 : i32, i32
  }
  func.func @transform_2(%arg0: i32) -> (i32, i32) {
    %c0_i32 = arith.constant 0 : i32
    %c0_i32_0 = arith.constant 0 : i32
    %c0_i32_1 = arith.constant 0 : i32
    return %c0_i32, %c0_i32_0 : i32, i32
  }
  func.func @transform_3(%arg0: i32) -> (i32, i32) {
    %c0_i32 = arith.constant 0 : i32
    %c0_i32_0 = arith.constant 0 : i32
    %c0_i32_1 = arith.constant 0 : i32
    return %c0_i32, %c0_i32_0 : i32, i32
  }
  func.func @transform_4(%arg0: i32) -> (i32, i32) {
    %c0_i32 = arith.constant 0 : i32
    %c0_i32_0 = arith.constant 0 : i32
    %c0_i32_1 = arith.constant 0 : i32
    return %c0_i32, %c0_i32_0 : i32, i32
  }
  func.func @transform_5(%arg0: i32) -> (i32, i32) {
    %c0_i32 = arith.constant 0 : i32
    %c0_i32_0 = arith.constant 0 : i32
    %c0_i32_1 = arith.constant 0 : i32
    return %c0_i32, %c0_i32_0 : i32, i32
  }
}

</mosaic_0001>

<bundles_post_ra>
// kernel: tpu_custom_call.1
= control target key start
LH: loop header
LB: loop body
LE: loop exit
PB: predicated region body
PF: predicated region fallthrough
CT: control target
= control target key end

     0   :  { %10 = vsyncpa [#allocation3], 0  ;;  %s2555_s0 = inlined_call_operand.hbm [shape: bf16[256,256], index: 0, kind: input, shape index: {}]   ;;  %s2556_s1 = inlined_call_operand.hbm [shape: bf16[256,128], index: 1, kind: input, shape index: {}]   ;;  %s2557_s2 = inlined_call_operand.vmem [shape: f32[1,128], index: 2, kind: input, shape index: {}]   ;;  %s2558_s3 = inlined_call_operand.hbm [shape: bf16[128,128], index: 3, kind: input, shape index: {}]   ;;  %s2559_s4 = inlined_call_operand.vmem [shape: f32[1,128], index: 4, kind: input, shape index: {}]   ;;  %s2560_s5 = inlined_call_operand.hbm [shape: f32[256,128], index: 5, kind: output, shape index: {}]  }
   0x1   :  { %11 = vsyncpa [#allocation6], 0  ;;  %s30_s20 = sshll.u32 %s2556_s1, 4  ;;  %s31_s20 = int_to_ptr.hbm [resolvable:$true] %s30_s20 }
   0x2   :  { %12 = vsyncpa [#allocation4], 0  ;;  %s1920_s21 = smov [#allocation5]   ;;  %s17_s25 = sshll.u32 %s2555_s0, 4  ;;  %s18_s25 = int_to_ptr.hbm [resolvable:$true] %s17_s25 }
   0x3   :  { %s32_s22 = sshll.u32 %s1920_s21, 4  ;;  %s1921_s26 = smov 64   ;;  %s33_s22 = int_to_ptr.vmem [resolvable:$true] %s32_s22 }
   0x4   :  { %s1922_s27 = smov 4   ;;  %s1923_s28 = smov [#allocation2]  }
   0x5   :  { %38 = dma.hbm_to_vmem [thread:$0]  %s31_s20, 2048, %s33_s22, [#allocation6], %s1921_s26, %s1921_s26, %s1922_s27  }
   0x6   :  { %s19_s29 = sshll.u32 %s1923_s28, 4  ;;  %s1924_s30 = smov 128   ;;  %s20_s29 = int_to_ptr.vmem [resolvable:$true] %s19_s29 }
   0x7   :  { %s1925_s6 = smov 8   ;;  %s45_s8 = sshll.u32 %s2558_s3, 4  ;;  %s46_s8 = int_to_ptr.hbm [resolvable:$true] %s45_s8 }
   0x8   :  { %25 = dma.hbm_to_vmem [thread:$0]  %s18_s25, 4096, %s20_s29, [#allocation3], %s1924_s30, %s1924_s30, %s1925_s6  }
   0x9   :  { %s1926_s9 = smov [#allocation7]  }
   0xa   :  { %s47_s0 = sshll.u32 %s1926_s9, 4  ;;  %s48_s0 = int_to_ptr.vmem [resolvable:$true] %s47_s0 }
   0xb   :  { %53 = dma.hbm_to_vmem [thread:$0]  %s46_s8, 1024, %s48_s0, [#allocation6], %s1921_s26, %s1921_s26, %s1922_s27  }
   0xc   :  { %1914 = dma.done.wait [#allocation3], 4096  }
   0xd   :  { %1915 = vsyncadd [#allocation3], 4294963200 }
   0xe   :  { %1916 = dma.done.wait [#allocation6], 3072  }
   0xf   :  { %1917 = vsyncadd [#allocation6], 4294964224  ;;  %v1639_v0 = vld [vmem:[#allocation5 + $0x38] sm:$0xff]  ;;  %v1638_v1 = vld [vmem:[#allocation5 + $0x30] sm:$0xff]  ;;  %s1362_s15 = sshll.u32 %s2560_s5, 4  ;;  %s1363_s15 = int_to_ptr.hbm [resolvable:$true] %s1362_s15 }
  0x10   :  { %1656 = vmatpush.bf16.msra.mxu1 %v1639_v0  ;;  %392 = vmatpush.bf16.msra.mxu0 %v1639_v0  ;;  %v1637_v2 = vld [vmem:[#allocation5 + $0x28] sm:$0xff]  ;;  %v1636_v3 = vld [vmem:[#allocation5 + $0x20] sm:$0xff]  ;;  %v1635_v4 = vld [vmem:[#allocation5 + $0x18] sm:$0xff] }
  0x11   :  { %1657 = vmatpush.bf16.msra.mxu2 %v1639_v0  ;;  %1658 = vmatpush.bf16.msra.mxu3 %v1639_v0  ;;  %v1634_v5 = vld [vmem:[#allocation5 + $0x10] sm:$0xff]  ;;  %v1633_v6 = vld [vmem:[#allocation5 + $0x8] sm:$0xff]  ;;  %v1632_v7 = vld [vmem:[#allocation5] sm:$0xff] }
  0x12   :  { %v1410_v8 = vld [vmem:[#allocation2 + $0x40] sm:$0xf]  ;;  %v1609_v9 = vld [vmem:[#allocation2 + $0x44] sm:$0xf0]  ;;  %v1647_v11 = vld [vmem:[#allocation5 + $0x78] sm:$0xff] }
  0x13   :  { %v1970_v10 = vor.u32 %v1609_v9, %v1410_v8  ;;  %v1646_v12 = vld [vmem:[#allocation5 + $0x70] sm:$0xff]  ;;  %v1645_v13 = vld [vmem:[#allocation5 + $0x68] sm:$0xff]  ;;  %v1611_v15 = vld [vmem:[#allocation2 + $0x54] sm:$0xf0] }
  0x14   :  { %1659 = vmatpush.bf16.msra.mxu1 %v1638_v1  ;;  %393 = vmatpush.bf16.msra.mxu0 %v1638_v1  ;;  %v1418_v14 = vld [vmem:[#allocation2 + $0x50] sm:$0xf]  ;;  %v1644_v16 = vld [vmem:[#allocation5 + $0x60] sm:$0xff]  ;;  %v1643_v18 = vld [vmem:[#allocation5 + $0x58] sm:$0xff] }
  0x15   :  { %1660 = vmatpush.bf16.msra.mxu2 %v1638_v1  ;;  %1661 = vmatpush.bf16.msra.mxu3 %v1638_v1  ;;  %v1973_v17 = vor.u32 %v1611_v15, %v1418_v14  ;;  %v1378_v19 = vld [vmem:[#allocation2] sm:$0xf]  ;;  %v1601_v20 = vld [vmem:[#allocation2 + $0x4] sm:$0xf0]  ;;  %v1642_v21 = vld [vmem:[#allocation5 + $0x50] sm:$0xff] }
  0x16   :  { %v1976_v22 = vor.u32 %v1601_v20, %v1378_v19  ;;  %v1641_v23 = vld [vmem:[#allocation5 + $0x48] sm:$0xff]  ;;  %v1426_v24 = vld [vmem:[#allocation2 + $0x60] sm:$0xf]  ;;  %v1386_v28 = vld [vmem:[#allocation2 + $0x10] sm:$0xf] }
  0x17   :  { %v1613_v25 = vld [vmem:[#allocation2 + $0x64] sm:$0xf0]  ;;  %v1640_v26 = vld [vmem:[#allocation5 + $0x40] sm:$0xff]  ;;  %v1603_v29 = vld [vmem:[#allocation2 + $0x14] sm:$0xf0] }
  0x18   :  { %1662 = vmatpush.bf16.msra.mxu1 %v1637_v2  ;;  %394 = vmatpush.bf16.msra.mxu0 %v1637_v2  ;;  %v1979_v27 = vor.u32 %v1613_v25, %v1426_v24  ;;  %v1982_v30 = vor.u32 %v1603_v29, %v1386_v28  ;;  %v1434_v31 = vld [vmem:[#allocation2 + $0x70] sm:$0xf]  ;;  %v1615_v32 = vld [vmem:[#allocation2 + $0x74] sm:$0xf0]  ;;  %v1394_v34 = vld [vmem:[#allocation2 + $0x20] sm:$0xf] }
  0x19   :  { %1663 = vmatpush.bf16.msra.mxu2 %v1637_v2  ;;  %1664 = vmatpush.bf16.msra.mxu3 %v1637_v2  ;;  %v1985_v33 = vor.u32 %v1615_v32, %v1434_v31  ;;  %v1605_v35 = vld [vmem:[#allocation2 + $0x24] sm:$0xf0]  ;;  %v1600_v37 = vld [vmem:[#allocation2 + $0x4] sm:$0xf]  ;;  %v1380_v38 = vld [vmem:[#allocation2 + $0x8] sm:$0xf0] }
  0x1a   :  { %v1988_v36 = vor.u32 %v1605_v35, %v1394_v34  ;;  %v1991_v39 = vor.u32 %v1600_v37, %v1380_v38  ;;  %v1402_v40 = vld [vmem:[#allocation2 + $0x30] sm:$0xf]  ;;  %v1607_v41 = vld [vmem:[#allocation2 + $0x34] sm:$0xf0]  ;;  %v1602_v43 = vld [vmem:[#allocation2 + $0x14] sm:$0xf] }
  0x1b   :  { %v1994_v42 = vor.u32 %v1607_v41, %v1402_v40  ;;  %v1388_v44 = vld [vmem:[#allocation2 + $0x18] sm:$0xf0]  ;;  %v1604_v46 = vld [vmem:[#allocation2 + $0x24] sm:$0xf]  ;;  %v1396_v47 = vld [vmem:[#allocation2 + $0x28] sm:$0xf0] }
  0x1c   :  { %1665 = vmatpush.bf16.msra.mxu1 %v1636_v3  ;;  %395 = vmatpush.bf16.msra.mxu0 %v1636_v3  ;;  %v1997_v45 = vor.u32 %v1602_v43, %v1388_v44  ;;  %v2000_v48 = vor.u32 %v1604_v46, %v1396_v47  ;;  %v1442_v49 = vld [vmem:[#allocation2 + $0x80] sm:$0xf]  ;;  %v1617_v50 = vld [vmem:[#allocation2 + $0x84] sm:$0xf0]  ;;  %v1606_v52 = vld [vmem:[#allocation2 + $0x34] sm:$0xf] }
  0x1d   :  { %1666 = vmatpush.bf16.msra.mxu2 %v1636_v3  ;;  %1667 = vmatpush.bf16.msra.mxu3 %v1636_v3  ;;  %v2003_v51 = vor.u32 %v1617_v50, %v1442_v49  ;;  %v1404_v53 = vld [vmem:[#allocation2 + $0x38] sm:$0xf0]  ;;  %v1450_v55 = vld [vmem:[#allocation2 + $0x90] sm:$0xf]  ;;  %v1619_v56 = vld [vmem:[#allocation2 + $0x94] sm:$0xf0] }
  0x1e   :  { %v2006_v54 = vor.u32 %v1606_v52, %v1404_v53  ;;  %v2009_v57 = vor.u32 %v1619_v56, %v1450_v55  ;;  %v1608_v58 = vld [vmem:[#allocation2 + $0x44] sm:$0xf]  ;;  %v1412_v59 = vld [vmem:[#allocation2 + $0x48] sm:$0xf0]  ;;  %v1458_v62 = vld [vmem:[#allocation2 + $0xa0] sm:$0xf] }
  0x1f   :  { %v2012_v60 = vor.u32 %v1608_v58, %v1412_v59  ;;  %v1621_v63 = vld [vmem:[#allocation2 + $0xa4] sm:$0xf0]  ;;  %v1610_v2 = vld [vmem:[#allocation2 + $0x54] sm:$0xf]  ;;  %v1420_v3 = vld [vmem:[#allocation2 + $0x58] sm:$0xf0] }
  0x20   :  { %1668 = vmatpush.bf16.msra.mxu1 %v1635_v4  ;;  %396 = vmatpush.bf16.msra.mxu0 %v1635_v4  ;;  %v2017_v0 = vor.u32 %v1621_v63, %v1458_v62  ;;  %v1466_v8 = vld [vmem:[#allocation2 + $0xb0] sm:$0xf]  ;;  %v1623_v9 = vld [vmem:[#allocation2 + $0xb4] sm:$0xf0]  ;;  %v1652_v14 = vld [vmem:[#allocation7 + $0x20] sm:$0xff] }
  0x21   :  { %1669 = vmatpush.bf16.msra.mxu2 %v1635_v4  ;;  %1670 = vmatpush.bf16.msra.mxu3 %v1635_v4  ;;  %v1655_v4 = vld [vmem:[#allocation7 + $0x38] sm:$0xff]  ;;  %v1612_v15 = vld [vmem:[#allocation2 + $0x64] sm:$0xf]  ;;  %v1444_v38 = vld [vmem:[#allocation2 + $0x88] sm:$0xf0] }
  0x22   :  { %v1648_v25 = vld [vmem:[#allocation7] sm:$0xff]  ;;  %v1436_v28 = vld [vmem:[#allocation2 + $0x78] sm:$0xf0]  ;;  %v1618_v58 = vld [vmem:[#allocation2 + $0x94] sm:$0xf] }
  0x23   :  { %v1616_v37 = vld [vmem:[#allocation2 + $0x84] sm:$0xf]  ;;  %v2051_v43 = vld [vmem:[%s2557_s2] ss:$0 sm:$0xff]  ;;  %v1452_v59 = vld [vmem:[#allocation2 + $0x98] sm:$0xf0] }
  0x24   :  { %1671 = vmatpush.bf16.msra.mxu1 %v1634_v5  ;;  %397 = vmatpush.bf16.msra.mxu0 %v1634_v5  ;;  %v2046_v40 = vor.u32 %v1616_v37, %v1444_v38  ;;  %v2056_v63 = vor.u32 %v1618_v58, %v1452_v59  ;;  %v1482_v37 = vld [vmem:[#allocation2 + $0xd0] sm:$0xf]  ;;  %v1627_v38 = vld [vmem:[#allocation2 + $0xd4] sm:$0xf0]  ;;  %v1468_v58 = vld [vmem:[#allocation2 + $0xb8] sm:$0xf0] }
  0x25   :  { %1672 = vmatpush.bf16.msra.mxu2 %v1634_v5  ;;  %1673 = vmatpush.bf16.msra.mxu3 %v1634_v5  ;;  %v2022_v5 = vor.u32 %v1610_v2, %v1420_v3  ;;  %v1474_v3 = vld [vmem:[#allocation2 + $0xc0] sm:$0xf] }
  0x28   :  { %1674 = vmatpush.bf16.msra.mxu1 %v1633_v6  ;;  %398 = vmatpush.bf16.msra.mxu0 %v1633_v6 }
  0x29   :  { %1675 = vmatpush.bf16.msra.mxu2 %v1633_v6  ;;  %1676 = vmatpush.bf16.msra.mxu3 %v1633_v6 }
  0x2c   :  { %1677 = vmatpush.bf16.msra.mxu1 %v1632_v7  ;;  %399 = vmatpush.bf16.msra.mxu0 %v1632_v7 }
  0x2d   :  { %1678 = vmatpush.bf16.msra.mxu2 %v1632_v7  ;;  %1679 = vmatpush.bf16.msra.mxu3 %v1632_v7  ;;  %v1654_v7 = vld [vmem:[#allocation7 + $0x30] sm:$0xff] }
  0x2f   :  { %420 = vmatmul.bf16.vlgmr.msra.gmra.mxu1 %v1970_v10  ;;  %400 = vmatmul.bf16.vlgmr.msra.gmra.mxu0 %v1976_v22 }
  0x30   :  { %481 = vmatpush.bf16.msrb.mxu1 %v1647_v11  ;;  %440 = vmatmul.bf16.vlgmr.msra.gmra.mxu2 %v2003_v51  ;;  %v2027_v11 = vor.u32 %v1623_v9, %v1466_v8 }
  0x31   :  { %682 = vmatpush.bf16.msrb.mxu2 %v1655_v4  ;;  %v1625_v4 = vld [vmem:[#allocation2 + $0xc4] sm:$0xf0] }
  0x34   :  { %482 = vmatpush.bf16.msrb.mxu1 %v1646_v12  ;;  %v1653_v12 = vld [vmem:[#allocation7 + $0x28] sm:$0xff] }
  0x35   :  { %683 = vmatpush.bf16.msrb.mxu2 %v1654_v7  ;;  %v2058_v7 = vor.u32 %v1625_v4, %v1474_v3  ;;  %v1490_v3 = vld [vmem:[#allocation2 + $0xe0] sm:$0xf]  ;;  %v1629_v4 = vld [vmem:[#allocation2 + $0xe4] sm:$0xf0] }
  0x37   :  { %460 = vmatmul.bf16.vlgmr.msra.gmra.mxu3 %v2058_v7 }
  0x38   :  { %483 = vmatpush.bf16.msrb.mxu1 %v1645_v13 }
  0x39   :  { %684 = vmatpush.bf16.msrb.mxu2 %v1653_v12 }
  0x3c   :  { %484 = vmatpush.bf16.msrb.mxu1 %v1644_v16  ;;  %v1428_v16 = vld [vmem:[#allocation2 + $0x68] sm:$0xf0] }
  0x3d   :  { %685 = vmatpush.bf16.msrb.mxu2 %v1652_v14  ;;  %v2032_v19 = vor.u32 %v1612_v15, %v1428_v16 }
  0x3f   :  { %425 = vmatmul.bf16.gmra.mxu1 %v1973_v17  ;;  %405 = vmatmul.bf16.gmra.mxu0 %v1982_v30 }
  0x40   :  { %485 = vmatpush.bf16.msrb.mxu1 %v1643_v18  ;;  %445 = vmatmul.bf16.gmra.mxu2 %v2009_v57  ;;  %v1651_v18 = vld [vmem:[#allocation7 + $0x18] sm:$0xff] }
  0x41   :  { %686 = vmatpush.bf16.msrb.mxu2 %v1651_v18 }
  0x44   :  { %486 = vmatpush.bf16.msrb.mxu1 %v1642_v21  ;;  %v1650_v21 = vld [vmem:[#allocation7 + $0x10] sm:$0xff] }
  0x45   :  { %687 = vmatpush.bf16.msrb.mxu2 %v1650_v21 }
  0x48   :  { %487 = vmatpush.bf16.msrb.mxu1 %v1641_v23  ;;  %v1649_v23 = vld [vmem:[#allocation7 + $0x8] sm:$0xff] }
  0x49   :  { %688 = vmatpush.bf16.msrb.mxu2 %v1649_v23  ;;  %v1620_v23 = vld [vmem:[#allocation2 + $0xa4] sm:$0xf] }
  0x4c   :  { %488 = vmatpush.bf16.msrb.mxu1 %v1640_v26  ;;  %v1614_v26 = vld [vmem:[#allocation2 + $0x74] sm:$0xf] }
  0x4d   :  { %689 = vmatpush.bf16.msrb.mxu2 %v1648_v25  ;;  %v2039_v31 = vor.u32 %v1614_v26, %v1436_v28  ;;  %v1460_v25 = vld [vmem:[#allocation2 + $0xa8] sm:$0xf0] }
  0x4e   :  { %v2064_v28 = vor.u32 %v1620_v23, %v1460_v25  ;;  %v1624_v25 = vld [vmem:[#allocation2 + $0xc4] sm:$0xf] }
  0x4f   :  { %430 = vmatmul.bf16.gmra.mxu1 %v1979_v27  ;;  %410 = vmatmul.bf16.gmra.mxu0 %v1988_v36 }
  0x50   :  { %450 = vmatmul.bf16.gmra.mxu2 %v2017_v0 }
  0x5f   :  { %435 = vmatmul.bf16.gmra.mxu1 %v1985_v33  ;;  %415 = vmatmul.bf16.gmra.mxu0 %v1994_v42 }
  0x60   :  { %455 = vmatmul.bf16.gmra.mxu2 %v2027_v11 }
  0x6f   :  { %489 = vmatmul.bf16.vlgmr.msrb.gmra.mxu1 %v1991_v39 }
  0x7f   :  { %494 = vmatmul.bf16.gmra.mxu1 %v1997_v45 }
  0x8f   :  { %499 = vmatmul.bf16.gmra.mxu1 %v2000_v48 }
  0x9f   :  { %504 = vmatmul.bf16.gmra.mxu1 %v2006_v54 }
  0xac   :  { %v2014_v61 = vpop.f32.mrf.mxu1  ;;  %v401_v29 = vpop.f32.mrf.mxu0 }
  0xad   :  { %v402_v46 = vadd.f32 %v2051_v43, %v401_v29 }
  0xaf   :  { %509 = vmatmul.bf16.gmra.mxu1 %v2012_v60 }
  0xb4   :  { %v2020_v1 = vpop.f32.mrf.mxu1  ;;  %v403_v35 = vpop.f32.mrf.mxu0 }
  0xb5   :  { %v404_v47 = vadd.f32 %v2051_v43, %v403_v35 }
  0xbc   :  { %v2024_v6 = vpop.f32.mrf.mxu1  ;;  %v406_v44 = vpop.f32.mrf.mxu0 }
  0xbd   :  { %v407_v8 = vadd.f32 %v2051_v43, %v406_v44 }
  0xbf   :  { %514 = vmatmul.bf16.gmra.mxu1 %v2022_v5 }
  0xc4   :  { %v2030_v13 = vpop.f32.mrf.mxu1  ;;  %v408_v56 = vpop.f32.mrf.mxu0 }
  0xc5   :  { %v409_v12 = vadd.f32 %v2051_v43, %v408_v56  ;;  %v1622_v56 = vld [vmem:[#allocation2 + $0xb4] sm:$0xf] }
  0xcc   :  { %v2034_v20 = vpop.f32.mrf.mxu1  ;;  %v411_v9 = vpop.f32.mrf.mxu0 }
  0xcd   :  { %v412_v44 = vadd.f32 %v2051_v43, %v411_v9 }
  0xcf   :  { %519 = vmatmul.bf16.gmra.mxu1 %v2032_v19 }
  0xd4   :  { %v2037_v24 = vpop.f32.mrf.mxu1  ;;  %v413_v29 = vpop.f32.mrf.mxu0 }
  0xdc   :  { %v2041_v32 = vpop.f32.mrf.mxu1 }
  0xdf   :  { %524 = vmatmul.bf16.gmra.mxu1 %v2039_v31 }
  0xe4   :  { %v2044_v34 = vpop.f32.mrf.mxu1 }
  0xec   :  { %v490_v41 = vpop.f32.mrf.mxu1 }
  0xed   :  { %v491_v49 = vadd.f32 %v490_v41, %v402_v46  ;;  %v2066_v41 = vor.u32 %v1627_v38, %v1482_v37  ;;  %v414_v46 = vadd.f32 %v2051_v43, %v413_v29  ;;  %v1498_v38 = vld [vmem:[#allocation2 + $0xf0] sm:$0xf] }
  0xef   :  { %529 = vmatmul.bf16.gmra.mxu1 %v2046_v40  ;;  %v570_v53 = vmax.f32 %v491_v49, 0.0  ;;  %465 = vmatmul.bf16.gmra.mxu3 %v2066_v41 }
  0xf4   :  { %v492_v50 = vpop.f32.mrf.mxu1 }
  0xf5   :  { %v493_v52 = vadd.f32 %v492_v50, %v404_v47 }
  0xf7   :  { %v571_v55 = vmax.f32 %v493_v52, 0.0  ;;  %v416_v52 = vpop.f32.mrf.mxu0 }
  0xf8   :  { %v417_v9 = vadd.f32 %v2051_v43, %v416_v52 }
  0xf9   :  { %v602_v62 = vpack.c.bf16 %v571_v55, %v570_v53 }
  0xfb   :  { %690 = vmatmul.bf16.vlgmr.msrb.gmra.mxu2 %v602_v62  ;;  %v2072_v62 = vor.u32 %v1622_v56, %v1468_v58 }
  0xfc   :  { %v495_v2 = vpop.f32.mrf.mxu1 }
  0xfd   :  { %v496_v14 = vadd.f32 %v495_v2, %v407_v8  ;;  %v2074_v8 = vor.u32 %v1629_v4, %v1490_v3 }
  0xff   :  { %534 = vmatmul.bf16.gmra.mxu1 %v2056_v63  ;;  %v572_v18 = vmax.f32 %v496_v14, 0.0  ;;  %470 = vmatmul.bf16.gmra.mxu3 %v2074_v8 }
 0x104   :  { %v497_v15 = vpop.f32.mrf.mxu1 }
 0x105   :  { %v498_v16 = vadd.f32 %v497_v15, %v409_v12  ;;  %v418_v12 = vpop.f32.mrf.mxu0 }
 0x106   :  { %v419_v14 = vadd.f32 %v2051_v43, %v418_v12 }
 0x107   :  { %v573_v21 = vmax.f32 %v498_v16, 0.0 }
 0x109   :  { %v603_v26 = vpack.c.bf16 %v573_v21, %v572_v18 }
 0x10b   :  { %695 = vmatmul.bf16.gmra.mxu2 %v603_v26  ;;  %v1476_v26 = vld [vmem:[#allocation2 + $0xc8] sm:$0xf0] }
 0x10c   :  { %v500_v35 = vpop.f32.mrf.mxu1 }
 0x10d   :  { %v501_v47 = vadd.f32 %v500_v35, %v412_v44  ;;  %v2080_v35 = vor.u32 %v1624_v25, %v1476_v26  ;;  %v1631_v44 = vld [vmem:[#allocation2 + $0xf4] sm:$0xf0]  ;;  %v1628_v25 = vld [vmem:[#allocation2 + $0xe4] sm:$0xf]  ;;  %v1492_v26 = vld [vmem:[#allocation2 + $0xe8] sm:$0xf0] }
 0x10f   :  { %539 = vmatmul.bf16.gmra.mxu1 %v2064_v28  ;;  %v574_v53 = vmax.f32 %v501_v47, 0.0  ;;  %v441_v47 = vpop.f32.mrf.mxu2 }
 0x114   :  { %v502_v49 = vpop.f32.mrf.mxu1 }
 0x115   :  { %v503_v50 = vadd.f32 %v502_v49, %v414_v46  ;;  %v2082_v46 = vor.u32 %v1631_v44, %v1498_v38  ;;  %v422_v49 = vadd.f32 %v2051_v43, %v2014_v61  ;;  %v427_v61 = vadd.f32 %v2051_v43, %v2024_v6 }
 0x116   :  { %v432_v6 = vadd.f32 %v2051_v43, %v2034_v20  ;;  %v437_v20 = vadd.f32 %v2051_v43, %v2041_v32 }
 0x117   :  { %v575_v55 = vmax.f32 %v503_v50, 0.0  ;;  %475 = vmatmul.bf16.gmra.mxu3 %v2082_v46  ;;  %v424_v50 = vadd.f32 %v2051_v43, %v2020_v1  ;;  %v443_v4 = vpop.f32.mrf.mxu2  ;;  %v429_v1 = vadd.f32 %v2051_v43, %v2030_v13  ;;  %v434_v13 = vadd.f32 %v2051_v43, %v2037_v24 }
 0x118   :  { %v439_v24 = vadd.f32 %v2051_v43, %v2044_v34 }
 0x119   :  { %v604_v59 = vpack.c.bf16 %v575_v55, %v574_v53 }
 0x11b   :  { %700 = vmatmul.bf16.gmra.mxu2 %v604_v59  ;;  %v1626_v59 = vld [vmem:[#allocation2 + $0xd4] sm:$0xf] }
 0x11c   :  { %v505_v2 = vpop.f32.mrf.mxu1 }
 0x11d   :  { %v506_v15 = vadd.f32 %v505_v2, %v417_v9  ;;  %v1484_v2 = vld [vmem:[#allocation2 + $0xd8] sm:$0xf0] }
 0x11e   :  { %v2090_v9 = vor.u32 %v1626_v59, %v1484_v2  ;;  %v1500_v59 = vld [vmem:[#allocation2 + $0xf8] sm:$0xf0] }
 0x11f   :  { %544 = vmatmul.bf16.gmra.mxu1 %v2072_v62  ;;  %v576_v21 = vmax.f32 %v506_v15, 0.0 }
 0x124   :  { %v507_v16 = vpop.f32.mrf.mxu1 }
 0x125   :  { %v508_v18 = vadd.f32 %v507_v16, %v419_v14  ;;  %v446_v16 = vpop.f32.mrf.mxu2 }
 0x127   :  { %v577_v23 = vmax.f32 %v508_v18, 0.0 }
 0x129   :  { %v605_v29 = vpack.c.bf16 %v577_v23, %v576_v21 }
 0x12b   :  { %705 = vmatmul.bf16.gmra.mxu2 %v605_v29 }
 0x12c   :  { %v510_v37 = vpop.f32.mrf.mxu1 }
 0x12d   :  { %v511_v52 = vadd.f32 %v510_v37, %v422_v49  ;;  %v2097_v37 = vor.u32 %v1628_v25, %v1492_v26  ;;  %v448_v44 = vpop.f32.mrf.mxu2 }
 0x12f   :  { %549 = vmatmul.bf16.gmra.mxu1 %v2080_v35  ;;  %v578_v56 = vmax.f32 %v511_v52, 0.0 }
 0x134   :  { %v512_v53 = vpop.f32.mrf.mxu1 }
 0x135   :  { %v513_v55 = vadd.f32 %v512_v53, %v424_v50 }
 0x137   :  { %v579_v58 = vmax.f32 %v513_v55, 0.0 }
 0x139   :  { %v606_v3 = vpack.c.bf16 %v579_v58, %v578_v56  ;;  %v451_v56 = vpop.f32.mrf.mxu2  ;;  %v1630_v58 = vld [vmem:[#allocation2 + $0xf4] sm:$0xf] }
 0x13b   :  { %710 = vmatmul.bf16.gmra.mxu2 %v606_v3  ;;  %v2104_v3 = vor.u32 %v1630_v58, %v1500_v59  ;;  %v447_v58 = vadd.f32 %v2051_v43, %v446_v16  ;;  %v449_v59 = vadd.f32 %v2051_v43, %v448_v44 }
 0x13c   :  { %v515_v12 = vpop.f32.mrf.mxu1 }
 0x13d   :  { %v516_v14 = vadd.f32 %v515_v12, %v427_v61 }
 0x13f   :  { %554 = vmatmul.bf16.gmra.mxu1 %v2090_v9  ;;  %v580_v21 = vmax.f32 %v516_v14, 0.0 }
 0x141   :  { %v453_v61 = vpop.f32.mrf.mxu2 }
 0x142   :  { %v454_v16 = vadd.f32 %v2051_v43, %v453_v61 }
 0x144   :  { %v517_v15 = vpop.f32.mrf.mxu1 }
 0x145   :  { %v518_v18 = vadd.f32 %v517_v15, %v429_v1 }
 0x147   :  { %v581_v23 = vmax.f32 %v518_v18, 0.0 }
 0x149   :  { %v607_v29 = vpack.c.bf16 %v581_v23, %v580_v21  ;;  %v456_v25 = vpop.f32.mrf.mxu2 }
 0x14b   :  { %715 = vmatmul.bf16.gmra.mxu2 %v607_v29  ;;  %v442_v29 = vadd.f32 %v2051_v43, %v441_v47 }
 0x14c   :  { %v520_v38 = vpop.f32.mrf.mxu1 }
 0x14d   :  { %v521_v49 = vadd.f32 %v520_v38, %v432_v6  ;;  %v444_v38 = vadd.f32 %v2051_v43, %v443_v4 }
 0x14f   :  { %559 = vmatmul.bf16.gmra.mxu1 %v2097_v37  ;;  %v582_v53 = vmax.f32 %v521_v49, 0.0 }
 0x151   :  { %v458_v49 = vpop.f32.mrf.mxu2 }
 0x152   :  { %v459_v61 = vadd.f32 %v2051_v43, %v458_v49 }
 0x154   :  { %v522_v50 = vpop.f32.mrf.mxu1 }
 0x155   :  { %v523_v52 = vadd.f32 %v522_v50, %v434_v13 }
 0x157   :  { %v583_v55 = vmax.f32 %v523_v52, 0.0 }
 0x159   :  { %v608_v2 = vpack.c.bf16 %v583_v55, %v582_v53 }
 0x15b   :  { %720 = vmatmul.bf16.gmra.mxu2 %v608_v2 }
 0x15c   :  { %v525_v12 = vpop.f32.mrf.mxu1 }
 0x15d   :  { %v526_v1 = vadd.f32 %v525_v12, %v437_v20 }
 0x15f   :  { %564 = vmatmul.bf16.gmra.mxu1 %v2104_v3  ;;  %v584_v18 = vmax.f32 %v526_v1, 0.0 }
 0x164   :  { %v527_v14 = vpop.f32.mrf.mxu1 }
 0x165   :  { %v528_v15 = vadd.f32 %v527_v14, %v439_v24 }
 0x167   :  { %v585_v21 = vmax.f32 %v528_v15, 0.0 }
 0x169   :  { %v609_v23 = vpack.c.bf16 %v585_v21, %v584_v18  ;;  %v452_v21 = vadd.f32 %v2051_v43, %v451_v56  ;;  %v457_v56 = vadd.f32 %v2051_v43, %v456_v25 }
 0x16b   :  { %725 = vmatmul.bf16.gmra.mxu2 %v609_v23 }
 0x16c   :  { %v530_v26 = vpop.f32.mrf.mxu1 }
 0x16d   :  { %v531_v6 = vadd.f32 %v530_v26, %v442_v29 }
 0x16f   :  { %v586_v50 = vmax.f32 %v531_v6, 0.0 }
 0x174   :  { %v532_v13 = vpop.f32.mrf.mxu1 }
 0x175   :  { %v533_v32 = vadd.f32 %v532_v13, %v444_v38 }
 0x177   :  { %v587_v52 = vmax.f32 %v533_v32, 0.0 }
 0x179   :  { %v610_v34 = vpack.c.bf16 %v587_v52, %v586_v50  ;;  %v461_v50 = vpop.f32.mrf.mxu3 }
 0x17a   :  { %v462_v25 = vadd.f32 %v2051_v43, %v461_v50 }
 0x17b   :  { %730 = vmatmul.bf16.gmra.mxu2 %v610_v34 }
 0x17c   :  { %v535_v53 = vpop.f32.mrf.mxu1 }
 0x17d   :  { %v536_v2 = vadd.f32 %v535_v53, %v447_v58 }
 0x17e   :  { %v2113_v55 = vpop.f32.mrf.mxu2 }
 0x17f   :  { %v588_v4 = vmax.f32 %v536_v2, 0.0 }
 0x184   :  { %v537_v12 = vpop.f32.mrf.mxu1 }
 0x185   :  { %v538_v47 = vadd.f32 %v537_v12, %v449_v59  ;;  %v463_v59 = vpop.f32.mrf.mxu3 }
 0x186   :  { %v2117_v20 = vpop.f32.mrf.mxu2  ;;  %v464_v49 = vadd.f32 %v2051_v43, %v463_v59 }
 0x187   :  { %v589_v24 = vmax.f32 %v538_v47, 0.0 }
 0x189   :  { %v611_v14 = vpack.c.bf16 %v589_v24, %v588_v4 }
 0x18b   :  { %735 = vmatmul.bf16.gmra.mxu2 %v611_v14 }
 0x18c   :  { %v540_v15 = vpop.f32.mrf.mxu1 }
 0x18d   :  { %v541_v44 = vadd.f32 %v540_v15, %v452_v21 }
 0x18e   :  { %v2121_v18 = vpop.f32.mrf.mxu2 }
 0x18f   :  { %v590_v38 = vmax.f32 %v541_v44, 0.0 }
 0x194   :  { %v542_v23 = vpop.f32.mrf.mxu1 }
 0x195   :  { %v543_v26 = vadd.f32 %v542_v23, %v454_v16  ;;  %v466_v16 = vpop.f32.mrf.mxu3 }
 0x196   :  { %v2125_v29 = vpop.f32.mrf.mxu2 }
 0x197   :  { %v591_v6 = vmax.f32 %v543_v26, 0.0 }
 0x199   :  { %v612_v32 = vpack.c.bf16 %v591_v6, %v590_v38 }
 0x19b   :  { %740 = vmatmul.bf16.gmra.mxu2 %v612_v32 }
 0x19c   :  { %v545_v52 = vpop.f32.mrf.mxu1 }
 0x19d   :  { %v546_v53 = vadd.f32 %v545_v52, %v457_v56  ;;  %v468_v56 = vpop.f32.mrf.mxu3 }
 0x19e   :  { %v2129_v34 = vpop.f32.mrf.mxu2  ;;  %v469_v50 = vadd.f32 %v2051_v43, %v468_v56 }
 0x19f   :  { %v592_v47 = vmax.f32 %v546_v53, 0.0 }
 0x1a4   :  { %v547_v58 = vpop.f32.mrf.mxu1 }
 0x1a5   :  { %v548_v2 = vadd.f32 %v547_v58, %v459_v61 }
 0x1a6   :  { %v2133_v12 = vpop.f32.mrf.mxu2 }
 0x1a7   :  { %v593_v4 = vmax.f32 %v548_v2, 0.0  ;;  %v773_v24 = vpack.c.bf16 %v2133_v12, %v2129_v34  ;;  %v467_v2 = vadd.f32 %v2051_v43, %v466_v16 }
 0x1a9   :  { %v613_v14 = vpack.c.bf16 %v593_v4, %v592_v47  ;;  %v471_v47 = vpop.f32.mrf.mxu3 }
 0x1ab   :  { %745 = vmatmul.bf16.gmra.mxu2 %v613_v14 }
 0x1ac   :  { %v550_v15 = vpop.f32.mrf.mxu1 }
 0x1ad   :  { %v551_v44 = vadd.f32 %v550_v15, %v462_v25 }
 0x1ae   :  { %v2137_v21 = vpop.f32.mrf.mxu2 }
 0x1af   :  { %v594_v6 = vmax.f32 %v551_v44, 0.0 }
 0x1b4   :  { %v552_v23 = vpop.f32.mrf.mxu1 }
 0x1b5   :  { %v553_v26 = vadd.f32 %v552_v23, %v464_v49  ;;  %v473_v23 = vpop.f32.mrf.mxu3 }
 0x1b6   :  { %v708_v38 = vpop.f32.mrf.mxu2 }
 0x1b7   :  { %v595_v32 = vmax.f32 %v553_v26, 0.0  ;;  %v774_v52 = vpack.c.bf16 %v708_v38, %v2137_v21  ;;  %v472_v38 = vadd.f32 %v2051_v43, %v471_v47 }
 0x1b9   :  { %v614_v61 = vpack.c.bf16 %v595_v32, %v594_v6  ;;  %v474_v6 = vadd.f32 %v2051_v43, %v473_v23 }
 0x1bb   :  { %750 = vmatmul.bf16.gmra.mxu2 %v614_v61 }
 0x1bc   :  { %v555_v53 = vpop.f32.mrf.mxu1 }
 0x1bd   :  { %v556_v4 = vadd.f32 %v555_v53, %v467_v2  ;;  %v476_v1 = vpop.f32.mrf.mxu3 }
 0x1be   :  { %v711_v58 = vpop.f32.mrf.mxu2 }
 0x1bf   :  { %v596_v25 = vmax.f32 %v556_v4, 0.0 }
 0x1c4   :  { %v557_v59 = vpop.f32.mrf.mxu1 }
 0x1c5   :  { %v558_v14 = vadd.f32 %v557_v59, %v469_v50 }
 0x1c6   :  { %v713_v15 = vpop.f32.mrf.mxu2 }
 0x1c7   :  { %v597_v49 = vmax.f32 %v558_v14, 0.0  ;;  %v477_v14 = vadd.f32 %v2051_v43, %v476_v1  ;;  %v775_v1 = vpack.c.bf16 %v713_v15, %v711_v58 }
 0x1c9   :  { %v615_v44 = vpack.c.bf16 %v597_v49, %v596_v25  ;;  %v478_v25 = vpop.f32.mrf.mxu3 }
 0x1ca   :  { %v479_v49 = vadd.f32 %v2051_v43, %v478_v25 }
 0x1cb   :  { %755 = vmatmul.bf16.gmra.mxu2 %v615_v44 }
 0x1cc   :  { %v560_v21 = vpop.f32.mrf.mxu1 }
 0x1cd   :  { %v561_v32 = vadd.f32 %v560_v21, %v472_v38 }
 0x1ce   :  { %v716_v26 = vpop.f32.mrf.mxu2 }
 0x1cf   :  { %v598_v53 = vmax.f32 %v561_v32, 0.0 }
 0x1d4   :  { %v562_v16 = vpop.f32.mrf.mxu1 }
 0x1d5   :  { %v563_v61 = vadd.f32 %v562_v16, %v474_v6 }
 0x1d6   :  { %v718_v56 = vpop.f32.mrf.mxu2 }
 0x1d7   :  { %v599_v2 = vmax.f32 %v563_v61, 0.0 }
 0x1d9   :  { %v616_v50 = vpack.c.bf16 %v599_v2, %v598_v53 }
 0x1db   :  { %760 = vmatmul.bf16.gmra.mxu2 %v616_v50  ;;  %v776_v50 = vpack.c.bf16 %v718_v56, %v716_v26 }
 0x1dc   :  { %v565_v4 = vpop.f32.mrf.mxu1 }
 0x1dd   :  { %v566_v44 = vadd.f32 %v565_v4, %v477_v14  ;;  %v2561_v14 = vpack.c.bf16 %v2125_v29, %v2121_v18 }
 0x1de   :  { %v721_v59 = vpop.f32.mrf.mxu2 }
 0x1df   :  { %v600_v21 = vmax.f32 %v566_v44, 0.0 }
 0x1e4   :  { %v567_v47 = vpop.f32.mrf.mxu1 }
 0x1e5   :  { %v568_v13 = vadd.f32 %v567_v47, %v479_v49 }
 0x1e6   :  { %v723_v23 = vpop.f32.mrf.mxu2 }
 0x1e7   :  { %v601_v38 = vmax.f32 %v568_v13, 0.0  ;;  %v777_v53 = vpack.c.bf16 %v723_v23, %v721_v59  ;;  %v2562_v59 = vpack.c.bf16 %v2117_v20, %v2113_v55 }
 0x1e9   :  { %v617_v6 = vpack.c.bf16 %v601_v38, %v600_v21 }
 0x1eb   :  { %765 = vmatmul.bf16.gmra.mxu2 %v617_v6 }
 0x1ee   :  { %v726_v16 = vpop.f32.mrf.mxu2 }
 0x1f6   :  { %v728_v32 = vpop.f32.mrf.mxu2 }
 0x1f7   :  { %v778_v61 = vpack.c.bf16 %v728_v32, %v726_v16 }
 0x1f9   :  { %791 = vmatpush.bf16.msrb.mxu3 %v778_v61 }
 0x1fd   :  { %792 = vmatpush.bf16.msrb.mxu3 %v777_v53 }
 0x1fe   :  { %v731_v2 = vpop.f32.mrf.mxu2 }
 0x201   :  { %793 = vmatpush.bf16.msrb.mxu3 %v776_v50 }
 0x205   :  { %794 = vmatpush.bf16.msrb.mxu3 %v775_v1 }
 0x206   :  { %v733_v43 = vpop.f32.mrf.mxu2 }
 0x207   :  { %v779_v4 = vpack.c.bf16 %v733_v43, %v731_v2 }
 0x209   :  { %795 = vmatpush.bf16.msrb.mxu3 %v774_v52 }
 0x20d   :  { %796 = vmatpush.bf16.msrb.mxu3 %v773_v24 }
 0x20e   :  { %v736_v13 = vpop.f32.mrf.mxu2 }
 0x211   :  { %797 = vmatpush.bf16.msrb.mxu3 %v2561_v14 }
 0x215   :  { %798 = vmatpush.bf16.msrb.mxu3 %v2562_v59 }
 0x216   :  { %v738_v26 = vpop.f32.mrf.mxu2 }
 0x217   :  { %v780_v56 = vpack.c.bf16 %v738_v26, %v736_v13 }
 0x218   :  { %799 = vmatmul.bf16.vlgmr.msrb.gmra.mxu3 %v1976_v22 }
 0x21e   :  { %v741_v58 = vpop.f32.mrf.mxu2 }
 0x226   :  { %v743_v15 = vpop.f32.mrf.mxu2 }
 0x227   :  { %v781_v52 = vpack.c.bf16 %v743_v15, %v741_v58 }
 0x228   :  { %804 = vmatmul.bf16.gmra.mxu3 %v1982_v30 }
 0x22e   :  { %v746_v34 = vpop.f32.mrf.mxu2 }
 0x236   :  { %v748_v12 = vpop.f32.mrf.mxu2 }
 0x237   :  { %v782_v24 = vpack.c.bf16 %v748_v12, %v746_v34 }
 0x238   :  { %809 = vmatmul.bf16.gmra.mxu3 %v1988_v36 }
 0x23e   :  { %v751_v18 = vpop.f32.mrf.mxu2 }
 0x246   :  { %v753_v29 = vpop.f32.mrf.mxu2 }
 0x247   :  { %v783_v23 = vpack.c.bf16 %v753_v29, %v751_v18 }
 0x248   :  { %814 = vmatmul.bf16.gmra.mxu3 %v1994_v42  ;;  %v969_v42 = vlaneseq }
 0x24e   :  { %v756_v55 = vpop.f32.mrf.mxu2 }
 0x256   :  { %v758_v20 = vpop.f32.mrf.mxu2 }
 0x257   :  { %v784_v36 = vpack.c.bf16 %v758_v20, %v756_v55 }
 0x258   :  { %819 = vmatmul.bf16.gmra.mxu3 %v1970_v10 }
 0x25e   :  { %v761_v25 = vpop.f32.mrf.mxu2 }
 0x266   :  { %v763_v22 = vpop.f32.mrf.mxu2 }
 0x267   :  { %v785_v47 = vpack.c.bf16 %v763_v22, %v761_v25 }
 0x268   :  { %824 = vmatmul.bf16.gmra.mxu3 %v1973_v17 }
 0x26e   :  { %v766_v49 = vpop.f32.mrf.mxu2 }
 0x276   :  { %v768_v44 = vpop.f32.mrf.mxu2 }
 0x277   :  { %v786_v30 = vpack.c.bf16 %v768_v44, %v766_v49 }
 0x278   :  { %829 = vmatmul.bf16.gmra.mxu3 %v1979_v27 }
 0x279   :  { %880 = vmatpush.bf16.msrb.mxu0 %v786_v30 }
 0x27d   :  { %881 = vmatpush.bf16.msrb.mxu0 %v785_v47 }
 0x281   :  { %882 = vmatpush.bf16.msrb.mxu0 %v784_v36 }
 0x285   :  { %883 = vmatpush.bf16.msrb.mxu0 %v783_v23 }
 0x288   :  { %834 = vmatmul.bf16.gmra.mxu3 %v1985_v33 }
 0x289   :  { %884 = vmatpush.bf16.msrb.mxu0 %v782_v24 }
 0x28d   :  { %885 = vmatpush.bf16.msrb.mxu0 %v781_v52 }
 0x291   :  { %886 = vmatpush.bf16.msrb.mxu0 %v780_v56 }
 0x295   :  { %887 = vmatpush.bf16.msrb.mxu0 %v779_v4 }
 0x298   :  { %888 = vmatmul.bf16.vlgmr.msrb.gmra.mxu0 %v1991_v39  ;;  %839 = vmatmul.bf16.gmra.mxu3 %v2003_v51 }
 0x29b   :  { %v800_v10 = vpop.f32.mrf.mxu3 }
 0x2a3   :  { %v802_v17 = vpop.f32.mrf.mxu3 }
 0x2a8   :  { %893 = vmatmul.bf16.gmra.mxu0 %v1997_v45  ;;  %844 = vmatmul.bf16.gmra.mxu3 %v2009_v57  ;;  %v2182_v45 = vld [vmem:[%s2559_s4] ss:$0 sm:$0xff]  ;;  %s1927_s4 = smov [#allocation8]  }
 0x2a9   :  { %v801_v51 = vadd.f32 %v2182_v45, %v800_v10  ;;  %s1360_s12 = sshll.u32 %s1927_s4, 4  ;;  %s1361_s12 = int_to_ptr.vmem [resolvable:$true] %s1360_s12 }
 0x2ab   :  { %v805_v27 = vpop.f32.mrf.mxu3 }
 0x2b3   :  { %v807_v33 = vpop.f32.mrf.mxu3 }
 0x2b4   :  { %v808_v16 = vadd.f32 %v2182_v45, %v807_v33 }
 0x2b8   :  { %898 = vmatmul.bf16.gmra.mxu0 %v2000_v48  ;;  %849 = vmatmul.bf16.gmra.mxu3 %v2017_v0  ;;  %v2184_v48 = vand.u32 127, %v969_v42 }
 0x2ba   :  { %vm971_vm0 = vcmp.lt.s32.totalorder %v2184_v48, 4 }
 0x2bb   :  { %v810_v39 = vpop.f32.mrf.mxu3 }
 0x2c8   :  { %903 = vmatmul.bf16.gmra.mxu0 %v2006_v54  ;;  %854 = vmatmul.bf16.gmra.mxu3 %v2027_v11  ;;  %v812_v54 = vpop.f32.mrf.mxu3  ;;  %v803_v11 = vadd.f32 %v2182_v45, %v802_v17 }
 0x2c9   :  { %v813_v4 = vadd.f32 %v2182_v45, %v812_v54 }
 0x2d8   :  { %908 = vmatmul.bf16.gmra.mxu0 %v2012_v60  ;;  %859 = vmatmul.bf16.gmra.mxu3 %v2058_v7 }
 0x2e8   :  { %913 = vmatmul.bf16.gmra.mxu0 %v2022_v5  ;;  %864 = vmatmul.bf16.gmra.mxu3 %v2066_v41  ;;  %v815_v5 = vpop.f32.mrf.mxu3  ;;  %v806_v41 = vadd.f32 %v2182_v45, %v805_v27 }
 0x2e9   :  { %v816_v26 = vadd.f32 %v2182_v45, %v815_v5 }
 0x2f8   :  { %918 = vmatmul.bf16.gmra.mxu0 %v2032_v19  ;;  %869 = vmatmul.bf16.gmra.mxu3 %v2074_v8 }
 0x308   :  { %923 = vmatmul.bf16.gmra.mxu0 %v2039_v31 }
 0x315   :  { %v889_v57 = vpop.f32.mrf.mxu0 }
 0x316   :  { %v890_v60 = vadd.f32 %v889_v57, %v801_v51 }
 0x318   :  { %928 = vmatmul.bf16.gmra.mxu0 %v2046_v40  ;;  %v2192_v0 = vsel %vm971_vm0, %v890_v60, -1e+30  ;;  %v817_v40 = vpop.f32.mrf.mxu3  ;;  %874 = vmatmul.bf16.gmra.mxu3 %v2082_v46  ;;  %v811_v46 = vadd.f32 %v2182_v45, %v810_v39 }
 0x319   :  { %1004 = vmax.xlane.f32.xlu0 %v2192_v0  ;;  %v818_v34 = vadd.f32 %v2182_v45, %v817_v40 }
 0x31d   :  { %v891_v19 = vpop.f32.mrf.mxu0 }
 0x31e   :  { %v892_v31 = vadd.f32 %v891_v19, %v803_v11 }
 0x320   :  { %v2198_v7 = vsel %vm971_vm0, %v892_v31, -1e+30  ;;  %v820_v6 = vpop.f32.mrf.mxu3 }
 0x321   :  { %1006 = vmax.xlane.f32.xlu0 %v2198_v7  ;;  %v821_v29 = vadd.f32 %v2182_v45, %v820_v6 }
 0x325   :  { %v894_v8 = vpop.f32.mrf.mxu0 }
 0x326   :  { %v895_v21 = vadd.f32 %v894_v8, %v806_v41 }
 0x328   :  { %933 = vmatmul.bf16.gmra.mxu0 %v2056_v63  ;;  %v2206_v38 = vsel %vm971_vm0, %v895_v21, -1e+30  ;;  %v822_v63 = vpop.f32.mrf.mxu3 }
 0x329   :  { %1008 = vmax.xlane.f32.xlu1 %v2206_v38  ;;  %v823_v22 = vadd.f32 %v2182_v45, %v822_v63 }
 0x32d   :  { %v896_v32 = vpop.f32.mrf.mxu0 }
 0x32e   :  { %v897_v61 = vadd.f32 %v896_v32, %v808_v16 }
 0x330   :  { %v2212_v53 = vsel %vm971_vm0, %v897_v61, -1e+30  ;;  %v825_v43 = vpop.f32.mrf.mxu3 }
 0x331   :  { %1010 = vmax.xlane.f32.xlu1 %v2212_v53  ;;  %v826_v36 = vadd.f32 %v2182_v45, %v825_v43 }
 0x335   :  { %v899_v2 = vpop.f32.mrf.mxu0 }
 0x336   :  { %v900_v50 = vadd.f32 %v899_v2, %v811_v46 }
 0x338   :  { %938 = vmatmul.bf16.gmra.mxu0 %v2064_v28  ;;  %v2219_v1 = vsel %vm971_vm0, %v900_v50, -1e+30  ;;  %v827_v28 = vpop.f32.mrf.mxu3 }
 0x339   :  { %1012 = vmax.xlane.f32.xlu2 %v2219_v1  ;;  %v828_v27 = vadd.f32 %v2182_v45, %v827_v28 }
 0x33d   :  { %v901_v13 = vpop.f32.mrf.mxu0 }
 0x33e   :  { %v902_v14 = vadd.f32 %v901_v13, %v813_v4 }
 0x340   :  { %v2225_v59 = vsel %vm971_vm0, %v902_v14, -1e+30  ;;  %v830_v52 = vpop.f32.mrf.mxu3 }
 0x341   :  { %1014 = vmax.xlane.f32.xlu2 %v2225_v59  ;;  %v831_v51 = vadd.f32 %v2182_v45, %v830_v52 }
 0x345   :  { %v904_v56 = vpop.f32.mrf.mxu0 }
 0x346   :  { %v905_v58 = vadd.f32 %v904_v56, %v816_v26 }
 0x348   :  { %943 = vmatmul.bf16.gmra.mxu0 %v2072_v62  ;;  %v2232_v15 = vsel %vm971_vm0, %v905_v58, -1e+30  ;;  %v832_v55 = vpop.f32.mrf.mxu3 }
 0x349   :  { %1016 = vmax.xlane.f32.xlu0 %v2232_v15  ;;  %v833_v5 = vadd.f32 %v2182_v45, %v832_v55 }
 0x34d   :  { %v906_v12 = vpop.f32.mrf.mxu0 }
 0x34e   :  { %v907_v24 = vadd.f32 %v906_v12, %v818_v34 }
 0x350   :  { %v2238_v18 = vsel %vm971_vm0, %v907_v24, -1e+30  ;;  %v835_v30 = vpop.f32.mrf.mxu3 }
 0x351   :  { %1018 = vmax.xlane.f32.xlu1 %v2238_v18  ;;  %v836_v40 = vadd.f32 %v2182_v45, %v835_v30 }
 0x355   :  { %v909_v62 = vpop.f32.mrf.mxu0 }
 0x356   :  { %v910_v20 = vadd.f32 %v909_v62, %v821_v29 }
 0x358   :  { %948 = vmatmul.bf16.gmra.mxu0 %v2080_v35  ;;  %v2245_v25 = vsel %vm971_vm0, %v910_v20, -1e+30  ;;  %v837_v17 = vpop.f32.mrf.mxu3 }
 0x359   :  { %1020 = vmax.xlane.f32.xlu2 %v2245_v25  ;;  %v838_v16 = vadd.f32 %v2182_v45, %v837_v17 }
 0x35d   :  { %v911_v49 = vpop.f32.mrf.mxu0 }
 0x35e   :  { %v912_v44 = vadd.f32 %v911_v49, %v823_v22 }
 0x360   :  { %v2251_v47 = vsel %vm971_vm0, %v912_v44, -1e+30 }
 0x361   :  { %1022 = vmax.xlane.f32.xlu0 %v2251_v47 }
 0x365   :  { %v914_v35 = vpop.f32.mrf.mxu0 }
 0x366   :  { %v915_v23 = vadd.f32 %v914_v35, %v826_v36 }
 0x368   :  { %953 = vmatmul.bf16.gmra.mxu0 %v2090_v9  ;;  %v2258_v10 = vsel %vm971_vm0, %v915_v23, -1e+30  ;;  %v840_v9 = vpop.f32.mrf.mxu3 }
 0x369   :  { %1024 = vmax.xlane.f32.xlu1 %v2258_v10  ;;  %v841_v43 = vadd.f32 %v2182_v45, %v840_v9 }
 0x36d   :  { %v916_v33 = vpop.f32.mrf.mxu0 }
 0x36e   :  { %v917_v39 = vadd.f32 %v916_v33, %v828_v27 }
 0x370   :  { %v2264_v42 = vsel %vm971_vm0, %v917_v39, -1e+30  ;;  %v842_v19 = vpop.f32.mrf.mxu3 }
 0x371   :  { %1026 = vmax.xlane.f32.xlu2 %v2264_v42  ;;  %v843_v52 = vadd.f32 %v2182_v45, %v842_v19 }
 0x375   :  { %v919_v54 = vpop.f32.mrf.mxu0 }
 0x376   :  { %v920_v57 = vadd.f32 %v919_v54, %v831_v51 }
 0x378   :  { %958 = vmatmul.bf16.gmra.mxu0 %v2097_v37  ;;  %v2271_v60 = vsel %vm971_vm0, %v920_v57, -1e+30  ;;  %v845_v21 = vpop.f32.mrf.mxu3 }
 0x379   :  { %1028 = vmax.xlane.f32.xlu0 %v2271_v60  ;;  %v846_v20 = vadd.f32 %v2182_v45, %v845_v21 }
 0x37d   :  { %v921_v11 = vpop.f32.mrf.mxu0 }
 0x37e   :  { %v922_v31 = vadd.f32 %v921_v11, %v833_v5 }
 0x380   :  { %v2277_v41 = vsel %vm971_vm0, %v922_v31, -1e+30 }
 0x381   :  { %1030 = vmax.xlane.f32.xlu1 %v2277_v41 }
 0x385   :  { %v924_v37 = vpop.f32.mrf.mxu0 }
 0x386   :  { %v925_v8 = vadd.f32 %v924_v37, %v836_v40 }
 0x388   :  { %963 = vmatmul.bf16.gmra.mxu0 %v2104_v3  ;;  %v2284_v6 = vsel %vm971_vm0, %v925_v8, -1e+30  ;;  %v847_v3 = vpop.f32.mrf.mxu3 }
 0x389   :  { %1032 = vmax.xlane.f32.xlu2 %v2284_v6  ;;  %v848_v17 = vadd.f32 %v2182_v45, %v847_v3 }
 0x38c   :  { %v1005_v32 = vpop.xlane.xlu0 %1004 }
 0x38d   :  { %v2289_v61 = vsub.f32 %v2192_v0, %v1005_v32  ;;  %v926_v46 = vpop.f32.mrf.mxu0 }
 0x38e   :  { %v927_v63 = vadd.f32 %v926_v46, %v838_v16 }
 0x38f   :  { %v1100_v2 = vmul.f32 1.442695, %v2289_v61 }
 0x390   :  { %v2294_v50 = vsel %vm971_vm0, %v927_v63, -1e+30  ;;  %v850_v58 = vpop.f32.mrf.mxu3 }
 0x391   :  { %1690 = vpow2.f32 %v1100_v2  ;;  %1034 = vmax.xlane.f32.xlu0 %v2294_v50  ;;  %v851_v5 = vadd.f32 %v2182_v45, %v850_v58 }
 0x394   :  { %v1007_v4 = vpop.xlane.xlu0 %1006 }
 0x395   :  { %v2299_v13 = vsub.f32 %v2198_v7, %v1007_v4  ;;  %v929_v0 = vpop.f32.mrf.mxu0 }
 0x396   :  { %v930_v14 = vadd.f32 %v929_v0, %v841_v43 }
 0x397   :  { %v1691_v26 = vpop.eup %1690  ;;  %v1102_v28 = vmul.f32 1.442695, %v2299_v13 }
 0x398   :  { %1164 = vadd.xlane.f32.xlu2 %v1691_v26  ;;  %v2304_v56 = vsel %vm971_vm0, %v930_v14, -1e+30  ;;  %v852_v44 = vpop.f32.mrf.mxu3 }
 0x399   :  { %1692 = vpow2.f32 %v1102_v28  ;;  %1036 = vmax.xlane.f32.xlu1 %v2304_v56  ;;  %v853_v16 = vadd.f32 %v2182_v45, %v852_v44 }
 0x39c   :  { %v1009_v34 = vpop.xlane.xlu1 %1008 }
 0x39d   :  { %v2309_v7 = vsub.f32 %v2206_v38, %v1009_v34  ;;  %v931_v12 = vpop.f32.mrf.mxu0 }
 0x39e   :  { %v932_v24 = vadd.f32 %v931_v12, %v843_v52 }
 0x39f   :  { %v1693_v29 = vpop.eup %1692  ;;  %v1104_v62 = vmul.f32 1.442695, %v2309_v7 }
 0x3a0   :  { %1166 = vadd.xlane.f32.xlu0 %v1693_v29  ;;  %v2314_v55 = vsel %vm971_vm0, %v932_v24, -1e+30  ;;  %v855_v54 = vpop.f32.mrf.mxu3 }
 0x3a1   :  { %1694 = vpow2.f32 %v1104_v62  ;;  %1038 = vmax.xlane.f32.xlu2 %v2314_v55  ;;  %v856_v4 = vadd.f32 %v2182_v45, %v855_v54 }
 0x3a4   :  { %v1011_v22 = vpop.xlane.xlu1 %1010 }
 0x3a5   :  { %v2319_v49 = vsub.f32 %v2212_v53, %v1011_v22  ;;  %v934_v38 = vpop.f32.mrf.mxu0 }
 0x3a6   :  { %v935_v30 = vadd.f32 %v934_v38, %v846_v20 }
 0x3a7   :  { %v1695_v36 = vpop.eup %1694  ;;  %v1106_v35 = vmul.f32 1.442695, %v2319_v49 }
 0x3a8   :  { %1168 = vadd.xlane.f32.xlu1 %v1695_v36  ;;  %v2324_v23 = vsel %vm971_vm0, %v935_v30, -1e+30  ;;  %v857_v21 = vpop.f32.mrf.mxu3 }
 0x3a9   :  { %1696 = vpow2.f32 %v1106_v35  ;;  %1040 = vmax.xlane.f32.xlu0 %v2324_v23  ;;  %v858_v12 = vadd.f32 %v2182_v45, %v857_v21 }
 0x3ac   :  { %v1013_v27 = vpop.xlane.xlu2 %1012 }
 0x3ad   :  { %v2329_v53 = vsub.f32 %v2219_v1, %v1013_v27  ;;  %v936_v33 = vpop.f32.mrf.mxu0 }
 0x3ae   :  { %v937_v39 = vadd.f32 %v936_v33, %v848_v17 }
 0x3af   :  { %v1697_v51 = vpop.eup %1696  ;;  %v1108_v9 = vmul.f32 1.442695, %v2329_v53 }
 0x3b0   :  { %1170 = vadd.xlane.f32.xlu2 %v1697_v51  ;;  %v2334_v57 = vsel %vm971_vm0, %v937_v39, -1e+30  ;;  %v860_v0 = vpop.f32.mrf.mxu3 }
 0x3b1   :  { %1698 = vpow2.f32 %v1108_v9  ;;  %1042 = vmax.xlane.f32.xlu1 %v2334_v57  ;;  %v861_v30 = vadd.f32 %v2182_v45, %v860_v0 }
 0x3b4   :  { %v1015_v11 = vpop.xlane.xlu2 %1014 }
 0x3b5   :  { %v2339_v1 = vsub.f32 %v2225_v59, %v1015_v11  ;;  %v939_v19 = vpop.f32.mrf.mxu0 }
 0x3b6   :  { %v940_v31 = vadd.f32 %v939_v19, %v851_v5 }
 0x3b7   :  { %v1699_v40 = vpop.eup %1698  ;;  %v1110_v37 = vmul.f32 1.442695, %v2339_v1 }
 0x3b8   :  { %1172 = vadd.xlane.f32.xlu0 %v1699_v40  ;;  %v2344_v8 = vsel %vm971_vm0, %v940_v31, -1e+30  ;;  %v862_v62 = vpop.f32.mrf.mxu3 }
 0x3b9   :  { %1700 = vpow2.f32 %v1110_v37  ;;  %1044 = vmax.xlane.f32.xlu2 %v2344_v8  ;;  %v863_v9 = vadd.f32 %v2182_v45, %v862_v62 }
 0x3bc   :  { %v1017_v32 = vpop.xlane.xlu0 %1016 }
 0x3bd   :  { %v2349_v59 = vsub.f32 %v2232_v15, %v1017_v32  ;;  %v941_v46 = vpop.f32.mrf.mxu0 }
 0x3be   :  { %v942_v63 = vadd.f32 %v941_v46, %v853_v16 }
 0x3bf   :  { %v1701_v2 = vpop.eup %1700  ;;  %v1112_v3 = vmul.f32 1.442695, %v2349_v59 }
 0x3c0   :  { %1174 = vadd.xlane.f32.xlu1 %v1701_v2  ;;  %v2354_v43 = vsel %vm971_vm0, %v942_v63, -1e+30  ;;  %v865_v39 = vpop.f32.mrf.mxu3 }
 0x3c1   :  { %1702 = vpow2.f32 %v1112_v3  ;;  %1046 = vmax.xlane.f32.xlu0 %v2354_v43  ;;  %v866_v21 = vadd.f32 %v2182_v45, %v865_v39 }
 0x3c4   :  { %v1019_v14 = vpop.xlane.xlu1 %1018 }
 0x3c5   :  { %v2359_v15 = vsub.f32 %v2238_v18, %v1019_v14  ;;  %v944_v26 = vpop.f32.mrf.mxu0 }
 0x3c6   :  { %v945_v28 = vadd.f32 %v944_v26, %v856_v4 }
 0x3c7   :  { %v1703_v58 = vpop.eup %1702  ;;  %v1114_v52 = vmul.f32 1.442695, %v2359_v15 }
 0x3c8   :  { %1176 = vadd.xlane.f32.xlu2 %v1703_v58  ;;  %v2364_v34 = vsel %vm971_vm0, %v945_v28, -1e+30  ;;  %v867_v37 = vpop.f32.mrf.mxu3 }
 0x3c9   :  { %1704 = vpow2.f32 %v1114_v52  ;;  %1048 = vmax.xlane.f32.xlu1 %v2364_v34  ;;  %v868_v2 = vadd.f32 %v2182_v45, %v867_v37 }
 0x3cc   :  { %v1021_v24 = vpop.xlane.xlu2 %1020 }
 0x3cd   :  { %v2369_v29 = vsub.f32 %v2245_v25, %v1021_v24  ;;  %v946_v18 = vpop.f32.mrf.mxu0 }
 0x3ce   :  { %v947_v20 = vadd.f32 %v946_v18, %v858_v12 }
 0x3cf   :  { %v1705_v22 = vpop.eup %1704  ;;  %v1116_v38 = vmul.f32 1.442695, %v2369_v29 }
 0x3d0   :  { %1178 = vadd.xlane.f32.xlu0 %v1705_v22  ;;  %v2374_v44 = vsel %vm971_vm0, %v947_v20, -1e+30  ;;  %v870_v63 = vpop.f32.mrf.mxu3 }
 0x3d1   :  { %1706 = vpow2.f32 %v1116_v38  ;;  %1050 = vmax.xlane.f32.xlu2 %v2374_v44  ;;  %v871_v14 = vadd.f32 %v2182_v45, %v870_v63 }
 0x3d4   :  { %v1023_v36 = vpop.xlane.xlu0 %1022 }
 0x3d5   :  { %v2379_v25 = vsub.f32 %v2251_v47, %v1023_v36  ;;  %v949_v35 = vpop.f32.mrf.mxu0 }
 0x3d6   :  { %v950_v17 = vadd.f32 %v949_v35, %v861_v30 }
 0x3d7   :  { %v1707_v27 = vpop.eup %1706  ;;  %v1118_v33 = vmul.f32 1.442695, %v2379_v25 }
 0x3d8   :  { %1180 = vadd.xlane.f32.xlu1 %v1707_v27  ;;  %v2384_v51 = vsel %vm971_vm0, %v950_v17, -1e+30  ;;  %v872_v28 = vpop.f32.mrf.mxu3 }
 0x3d9   :  { %1708 = vpow2.f32 %v1118_v33  ;;  %1052 = vmax.xlane.f32.xlu0 %v2384_v51  ;;  %v873_v62 = vadd.f32 %v2182_v45, %v872_v28 }
 0x3dc   :  { %v1025_v54 = vpop.xlane.xlu1 %1024 }
 0x3dd   :  { %v2389_v47 = vsub.f32 %v2258_v10, %v1025_v54  ;;  %v951_v5 = vpop.f32.mrf.mxu0 }
 0x3de   :  { %v952_v11 = vadd.f32 %v951_v5, %v863_v9 }
 0x3df   :  { %v1709_v19 = vpop.eup %1708  ;;  %v1120_v31 = vmul.f32 1.442695, %v2389_v47 }
 0x3e0   :  { %1182 = vadd.xlane.f32.xlu2 %v1709_v19  ;;  %v2394_v40 = vsel %vm971_vm0, %v952_v11, -1e+30  ;;  %v875_v36 = vpop.f32.mrf.mxu3 }
 0x3e1   :  { %1710 = vpow2.f32 %v1120_v31  ;;  %1054 = vmax.xlane.f32.xlu1 %v2394_v40 }
 0x3e4   :  { %v1027_v18 = vpop.xlane.xlu2 %1026 }
 0x3e5   :  { %v954_v16 = vpop.f32.mrf.mxu0  ;;  %v2440_v37 = vsub.f32 %v2264_v42, %v1027_v18 }
 0x3e6   :  { %v955_v32 = vadd.f32 %v954_v16, %v866_v21 }
 0x3e7   :  { %v1711_v10 = vpop.eup %1710  ;;  %v1122_v63 = vmul.f32 1.442695, %v2440_v37 }
 0x3e8   :  { %1184 = vadd.xlane.f32.xlu0 %v1711_v10  ;;  %v2400_v46 = vsel %vm971_vm0, %v955_v32, -1e+30 }
 0x3e9   :  { %1056 = vmax.xlane.f32.xlu2 %v2400_v46 }
 0x3ec   :  { %v1029_v52 = vpop.xlane.xlu0 %1028 }
 0x3ed   :  { %v956_v3 = vpop.f32.mrf.mxu0  ;;  %v2416_v24 = vsub.f32 %v2271_v60, %v1029_v52  ;;  %v876_v60 = vadd.f32 %v2182_v45, %v875_v36 }
 0x3ee   :  { %v957_v4 = vadd.f32 %v956_v3, %v868_v2 }
 0x3ef   :  { %v1124_v22 = vmul.f32 1.442695, %v2416_v24 }
 0x3f0   :  { %v2406_v0 = vsel %vm971_vm0, %v957_v4, -1e+30 }
 0x3f1   :  { %1058 = vmax.xlane.f32.xlu0 %v2406_v0  ;;  %1712 = vpow2.f32 %v1124_v22 }
 0x3f4   :  { %v1031_v30 = vpop.xlane.xlu1 %1030 }
 0x3f5   :  { %v959_v26 = vpop.f32.mrf.mxu0  ;;  %v2426_v17 = vsub.f32 %v2277_v41, %v1031_v30  ;;  %v877_v41 = vpop.f32.mrf.mxu3 }
 0x3f6   :  { %v960_v58 = vadd.f32 %v959_v26, %v871_v14  ;;  %v878_v21 = vadd.f32 %v2182_v45, %v877_v41 }
 0x3f7   :  { %v1126_v54 = vmul.f32 1.442695, %v2426_v17  ;;  %v1713_v19 = vpop.eup %1712 }
 0x3f8   :  { %v2412_v12 = vsel %vm971_vm0, %v960_v58, -1e+30 }
 0x3f9   :  { %1060 = vmax.xlane.f32.xlu1 %v2412_v12 }
 0x3fc   :  { %v1033_v27 = vpop.xlane.xlu2 %1032 }
 0x3fd   :  { %v961_v20 = vpop.f32.mrf.mxu0 }
 0x3fe   :  { %v962_v38 = vadd.f32 %v961_v20, %v873_v62 }
 0x400   :  { %v2422_v35 = vsel %vm971_vm0, %v962_v38, -1e+30 }
 0x401   :  { %1062 = vmax.xlane.f32.xlu2 %v2422_v35 }
 0x404   :  { %v1035_v33 = vpop.xlane.xlu0 %1034 }
 0x405   :  { %v2430_v39 = vsub.f32 %v2294_v50, %v1035_v33  ;;  %v964_v9 = vpop.f32.mrf.mxu0 }
 0x406   :  { %v965_v5 = vadd.f32 %v964_v9, %v876_v60 }
 0x407   :  { %v1130_v11 = vmul.f32 1.442695, %v2430_v39 }
 0x408   :  { %v2436_v31 = vsel %vm971_vm0, %v965_v5, -1e+30 }
 0x409   :  { %1714 = vpow2.f32 %v1130_v11  ;;  %1064 = vmax.xlane.f32.xlu0 %v2436_v31  ;;  %1188 = vadd.xlane.f32.xlu2 %v1713_v19 }
 0x40a   :  { %1716 = vpow2.f32 %v1126_v54 }
 0x40b   :  { %v1165_v50 = vpop.xlane.xlu2 %1164 }
 0x40c   :  { %1718 = vlog2.f32 %v1165_v50  ;;  %v1037_v16 = vpop.xlane.xlu1 %1036 }
 0x40d   :  { %v2444_v32 = vsub.f32 %v2304_v56, %v1037_v16  ;;  %v966_v10 = vpop.f32.mrf.mxu0  ;;  %v2454_v56 = vsub.f32 %v2284_v6, %v1033_v27 }
 0x40e   :  { %v967_v2 = vadd.f32 %v966_v10, %v878_v21 }
 0x40f   :  { %v1715_v3 = vpop.eup %1714  ;;  %v1132_v4 = vmul.f32 1.442695, %v2444_v32  ;;  %v1128_v52 = vmul.f32 1.442695, %v2454_v56 }
 0x410   :  { %v1717_v14 = vpop.eup %1716  ;;  %v2450_v42 = vsel %vm971_vm0, %v967_v2, -1e+30 }
 0x411   :  { %1720 = vpow2.f32 %v1132_v4  ;;  %1066 = vmax.xlane.f32.xlu1 %v2450_v42  ;;  %1190 = vadd.xlane.f32.xlu0 %v1717_v14 }
 0x412   :  { %v1719_v45 = vpop.eup %1718  ;;  %1722 = vpow2.f32 %v1122_v63  ;;  %1194 = vadd.xlane.f32.xlu2 %v1715_v3 }
 0x413   :  { %v1229_v26 = vmul.f32 0.6931472, %v1719_v45  ;;  %v1167_v28 = vpop.xlane.xlu0 %1166 }
 0x414   :  { %1724 = vlog2.f32 %v1167_v28  ;;  %v1039_v18 = vpop.xlane.xlu2 %1038 }
 0x415   :  { %v1292_v58 = vsub.f32 %v2289_v61, %v1229_v26  ;;  %1726 = vpow2.f32 %v1128_v52  ;;  %v2459_v22 = vsub.f32 %v2314_v55, %v1039_v18 }
 0x417   :  { %v1721_v48 = vpop.eup %1720  ;;  %1324 = vst [vmem:[#allocation8] sm:$0xff] %v1292_v58  ;;  %v1134_v60 = vmul.f32 1.442695, %v2459_v22 }
 0x418   :  { %v1723_v62 = vpop.eup %1722 }
 0x419   :  { %1186 = vadd.xlane.f32.xlu1 %v1723_v62  ;;  %1196 = vadd.xlane.f32.xlu0 %v1721_v48 }
 0x41a   :  { %v1725_v20 = vpop.eup %1724 }
 0x41b   :  { %v1231_v6 = vmul.f32 0.6931472, %v1725_v20  ;;  %v1169_v38 = vpop.xlane.xlu1 %1168  ;;  %v1727_v33 = vpop.eup %1726 }
 0x41c   :  { %1728 = vlog2.f32 %v1169_v38  ;;  %v1041_v30 = vpop.xlane.xlu0 %1040 }
 0x41d   :  { %v1293_v36 = vsub.f32 %v2299_v13, %v1231_v6  ;;  %v2463_v61 = vsub.f32 %v2324_v23, %v1041_v30 }
 0x41f   :  { %1325 = vst [vmem:[#allocation8 + $0x8] sm:$0xff] %v1293_v36  ;;  %v1136_v27 = vmul.f32 1.442695, %v2463_v61 }
 0x421   :  { %1730 = vpow2.f32 %v1136_v27  ;;  %1192 = vadd.xlane.f32.xlu1 %v1727_v33 }
 0x422   :  { %v1729_v9 = vpop.eup %1728  ;;  %1732 = vpow2.f32 %v1134_v60 }
 0x423   :  { %v1233_v55 = vmul.f32 0.6931472, %v1729_v9  ;;  %v1171_v54 = vpop.xlane.xlu2 %1170 }
 0x424   :  { %1734 = vlog2.f32 %v1171_v54  ;;  %v1043_v5 = vpop.xlane.xlu1 %1042 }
 0x425   :  { %v1294_v11 = vsub.f32 %v2309_v7, %v1233_v55  ;;  %v2469_v13 = vsub.f32 %v2334_v57, %v1043_v5 }
 0x427   :  { %v1731_v23 = vpop.eup %1730  ;;  %1326 = vst [vmem:[#allocation8 + $0x10] sm:$0xff] %v1294_v11  ;;  %v1138_v19 = vmul.f32 1.442695, %v2469_v13 }
 0x428   :  { %v1733_v41 = vpop.eup %1732  ;;  %1200 = vadd.xlane.f32.xlu2 %v1731_v23 }
 0x429   :  { %1736 = vpow2.f32 %v1138_v19  ;;  %1198 = vadd.xlane.f32.xlu1 %v1733_v41 }
 0x42a   :  { %v1735_v50 = vpop.eup %1734 }
 0x42b   :  { %v1235_v21 = vmul.f32 0.6931472, %v1735_v50  ;;  %v1173_v16 = vpop.xlane.xlu0 %1172 }
 0x42c   :  { %1738 = vlog2.f32 %v1173_v16  ;;  %v1045_v10 = vpop.xlane.xlu2 %1044 }
 0x42d   :  { %v1295_v63 = vsub.f32 %v2319_v49, %v1235_v21  ;;  %v2474_v7 = vsub.f32 %v2344_v8, %v1045_v10 }
 0x42f   :  { %v1737_v57 = vpop.eup %1736  ;;  %1327 = vst [vmem:[#allocation8 + $0x18] sm:$0xff] %v1295_v63  ;;  %v1140_v2 = vmul.f32 1.442695, %v2474_v7 }
 0x430   :  { %1202 = vadd.xlane.f32.xlu0 %v1737_v57 }
 0x431   :  { %1740 = vpow2.f32 %v1140_v2 }
 0x432   :  { %v1739_v3 = vpop.eup %1738 }
 0x433   :  { %v1237_v4 = vmul.f32 0.6931472, %v1739_v3  ;;  %v1175_v14 = vpop.xlane.xlu1 %1174 }
 0x434   :  { %1742 = vlog2.f32 %v1175_v14  ;;  %v1047_v45 = vpop.xlane.xlu0 %1046 }
 0x435   :  { %v1296_v26 = vsub.f32 %v2329_v53, %v1237_v4  ;;  %v2479_v28 = vsub.f32 %v2354_v43, %v1047_v45 }
 0x437   :  { %v1741_v49 = vpop.eup %1740  ;;  %1328 = vst [vmem:[#allocation8 + $0x20] sm:$0xff] %v1296_v26  ;;  %v1142_v8 = vmul.f32 1.442695, %v2479_v28 }
 0x438   :  { %1204 = vadd.xlane.f32.xlu1 %v1741_v49 }
 0x439   :  { %1744 = vpow2.f32 %v1142_v8 }
 0x43a   :  { %v1743_v58 = vpop.eup %1742 }
 0x43b   :  { %v1239_v52 = vmul.f32 0.6931472, %v1743_v58  ;;  %v1177_v48 = vpop.xlane.xlu2 %1176 }
 0x43c   :  { %1746 = vlog2.f32 %v1177_v48  ;;  %v1049_v18 = vpop.xlane.xlu1 %1048 }
 0x43d   :  { %v1297_v62 = vsub.f32 %v2339_v1, %v1239_v52  ;;  %v2484_v20 = vsub.f32 %v2364_v34, %v1049_v18 }
 0x43f   :  { %v1745_v53 = vpop.eup %1744  ;;  %1329 = vst [vmem:[#allocation8 + $0x28] sm:$0xff] %v1297_v62  ;;  %v1144_v43 = vmul.f32 1.442695, %v2484_v20 }
 0x440   :  { %1206 = vadd.xlane.f32.xlu2 %v1745_v53 }
 0x441   :  { %1748 = vpow2.f32 %v1144_v43 }
 0x442   :  { %v1747_v6 = vpop.eup %1746 }
 0x443   :  { %v1241_v38 = vmul.f32 0.6931472, %v1747_v6  ;;  %v1179_v30 = vpop.xlane.xlu0 %1178 }
 0x444   :  { %1750 = vlog2.f32 %v1179_v30  ;;  %v1051_v36 = vpop.xlane.xlu2 %1050 }
 0x445   :  { %v1298_v60 = vsub.f32 %v2349_v59, %v1241_v38  ;;  %v2489_v27 = vsub.f32 %v2374_v44, %v1051_v36 }
 0x447   :  { %v1749_v1 = vpop.eup %1748  ;;  %1330 = vst [vmem:[#allocation8 + $0x30] sm:$0xff] %v1298_v60  ;;  %v1146_v34 = vmul.f32 1.442695, %v2489_v27 }
 0x448   :  { %1208 = vadd.xlane.f32.xlu0 %v1749_v1 }
 0x449   :  { %1752 = vpow2.f32 %v1146_v34 }
 0x44a   :  { %v1751_v33 = vpop.eup %1750 }
 0x44b   :  { %v1243_v9 = vmul.f32 0.6931472, %v1751_v33  ;;  %v1181_v55 = vpop.xlane.xlu1 %1180 }
 0x44c   :  { %1754 = vlog2.f32 %v1181_v55  ;;  %v1053_v54 = vpop.xlane.xlu0 %1052 }
 0x44d   :  { %v1299_v5 = vsub.f32 %v2359_v15, %v1243_v9  ;;  %v2494_v11 = vsub.f32 %v2384_v51, %v1053_v54 }
 0x44f   :  { %v1753_v59 = vpop.eup %1752  ;;  %1331 = vst [vmem:[#allocation8 + $0x38] sm:$0xff] %v1299_v5  ;;  %v1148_v44 = vmul.f32 1.442695, %v2494_v11 }
 0x450   :  { %1210 = vadd.xlane.f32.xlu1 %v1753_v59 }
 0x451   :  { %1756 = vpow2.f32 %v1148_v44 }
 0x452   :  { %v1755_v23 = vpop.eup %1754 }
 0x453   :  { %v1245_v19 = vmul.f32 0.6931472, %v1755_v23  ;;  %v1183_v41 = vpop.xlane.xlu2 %1182 }
 0x454   :  { %1758 = vlog2.f32 %v1183_v41  ;;  %v1055_v50 = vpop.xlane.xlu1 %1054 }
 0x455   :  { %v1300_v21 = vsub.f32 %v2369_v29, %v1245_v19  ;;  %v2499_v16 = vsub.f32 %v2394_v40, %v1055_v50 }
 0x457   :  { %v1757_v15 = vpop.eup %1756  ;;  %1332 = vst [vmem:[#allocation8 + $0x40] sm:$0xff] %v1300_v21  ;;  %v1150_v51 = vmul.f32 1.442695, %v2499_v16 }
 0x458   :  { %1212 = vadd.xlane.f32.xlu2 %v1757_v15 }
 0x459   :  { %1760 = vpow2.f32 %v1150_v51 }
 0x45a   :  { %v1759_v10 = vpop.eup %1758 }
 0x45b   :  { %v1247_v63 = vmul.f32 0.6931472, %v1759_v10  ;;  %v1185_v57 = vpop.xlane.xlu0 %1184 }
 0x45c   :  { %1762 = vlog2.f32 %v1185_v57  ;;  %v1057_v2 = vpop.xlane.xlu2 %1056 }
 0x45d   :  { %v1301_v3 = vsub.f32 %v2379_v25, %v1247_v63  ;;  %v2504_v4 = vsub.f32 %v2400_v46, %v1057_v2 }
 0x45f   :  { %v1761_v29 = vpop.eup %1760  ;;  %1333 = vst [vmem:[#allocation8 + $0x48] sm:$0xff] %v1301_v3  ;;  %v1152_v40 = vmul.f32 1.442695, %v2504_v4 }
 0x460   :  { %1214 = vadd.xlane.f32.xlu0 %v1761_v29 }
 0x461   :  { %1764 = vpow2.f32 %v1152_v40 }
 0x462   :  { %v1763_v14 = vpop.eup %1762 }
 0x463   :  { %v1249_v45 = vmul.f32 0.6931472, %v1763_v14 }
 0x464   :  { %v1059_v26 = vpop.xlane.xlu0 %1058 }
 0x465   :  { %v1302_v49 = vsub.f32 %v2389_v47, %v1249_v45  ;;  %v2509_v8 = vsub.f32 %v2406_v0, %v1059_v26 }
 0x467   :  { %v1765_v58 = vpop.eup %1764  ;;  %1334 = vst [vmem:[#allocation8 + $0x50] sm:$0xff] %v1302_v49  ;;  %v1154_v25 = vmul.f32 1.442695, %v2509_v8 }
 0x468   :  { %1216 = vadd.xlane.f32.xlu1 %v1765_v58 }
 0x469   :  { %1766 = vpow2.f32 %v1154_v25 }
 0x46c   :  { %v1061_v46 = vpop.xlane.xlu1 %1060 }
 0x46d   :  { %v2513_v52 = vsub.f32 %v2412_v12, %v1061_v46 }
 0x46f   :  { %v1767_v48 = vpop.eup %1766  ;;  %v1156_v18 = vmul.f32 1.442695, %v2513_v52 }
 0x470   :  { %1218 = vadd.xlane.f32.xlu2 %v1767_v48 }
 0x471   :  { %1768 = vpow2.f32 %v1156_v18 }
 0x474   :  { %v1063_v62 = vpop.xlane.xlu2 %1062 }
 0x475   :  { %v2517_v47 = vsub.f32 %v2422_v35, %v1063_v62 }
 0x477   :  { %v1769_v0 = vpop.eup %1768  ;;  %v1158_v53 = vmul.f32 1.442695, %v2517_v47 }
 0x478   :  { %1220 = vadd.xlane.f32.xlu0 %v1769_v0 }
 0x479   :  { %1770 = vpow2.f32 %v1158_v53 }
 0x47c   :  { %v1189_v43 = vpop.xlane.xlu2 %1188  ;;  %v1065_v6 = vpop.xlane.xlu0 %1064 }
 0x47d   :  { %1772 = vlog2.f32 %v1189_v43  ;;  %v2521_v12 = vsub.f32 %v2436_v31, %v1065_v6 }
 0x47f   :  { %v1771_v38 = vpop.eup %1770  ;;  %v1160_v30 = vmul.f32 1.442695, %v2521_v12 }
 0x480   :  { %1222 = vadd.xlane.f32.xlu1 %v1771_v38 }
 0x481   :  { %1774 = vpow2.f32 %v1160_v30 }
 0x483   :  { %v1773_v36 = vpop.eup %1772 }
 0x484   :  { %v1253_v60 = vmul.f32 0.6931472, %v1773_v36  ;;  %v1067_v35 = vpop.xlane.xlu1 %1066  ;;  %v1191_v1 = vpop.xlane.xlu0 %1190 }
 0x485   :  { %v2525_v34 = vsub.f32 %v2450_v42, %v1067_v35  ;;  %v1195_v33 = vpop.xlane.xlu2 %1194  ;;  %1776 = vlog2.f32 %v1191_v1 }
 0x486   :  { %v1304_v9 = vsub.f32 %v2416_v24, %v1253_v60  ;;  %1778 = vlog2.f32 %v1195_v33 }
 0x487   :  { %v1775_v55 = vpop.eup %1774  ;;  %v1162_v31 = vmul.f32 1.442695, %v2525_v34 }
 0x488   :  { %1336 = vst [vmem:[#allocation8 + $0x60] sm:$0xff] %v1304_v9  ;;  %1224 = vadd.xlane.f32.xlu2 %v1775_v55 }
 0x489   :  { %1780 = vpow2.f32 %v1162_v31 }
 0x48b   :  { %v1777_v54 = vpop.eup %1776 }
 0x48c   :  { %v1779_v5 = vpop.eup %1778  ;;  %v1255_v59 = vmul.f32 0.6931472, %v1777_v54  ;;  %v1187_v44 = vpop.xlane.xlu1 %1186 }
 0x48d   :  { %v1197_v23 = vpop.xlane.xlu0 %1196  ;;  %v1259_v19 = vmul.f32 0.6931472, %v1779_v5  ;;  %1782 = vlog2.f32 %v1187_v44 }
 0x48e   :  { %v1305_v42 = vsub.f32 %v2426_v17, %v1255_v59  ;;  %1784 = vlog2.f32 %v1197_v23 }
 0x48f   :  { %v1781_v41 = vpop.eup %1780  ;;  %v1307_v24 = vsub.f32 %v2430_v39, %v1259_v19 }
 0x490   :  { %1337 = vst [vmem:[#allocation8 + $0x68] sm:$0xff] %v1305_v42  ;;  %1226 = vadd.xlane.f32.xlu0 %v1781_v41 }
 0x491   :  { %1339 = vst [vmem:[#allocation8 + $0x78] sm:$0xff] %v1307_v24 }
 0x493   :  { %v1783_v50 = vpop.eup %1782 }
 0x494   :  { %v1785_v21 = vpop.eup %1784  ;;  %v1251_v15 = vmul.f32 0.6931472, %v1783_v50  ;;  %v1193_v51 = vpop.xlane.xlu1 %1192 }
 0x495   :  { %v1261_v10 = vmul.f32 0.6931472, %v1785_v21  ;;  %1786 = vlog2.f32 %v1193_v51 }
 0x496   :  { %v1303_v63 = vsub.f32 %v2440_v37, %v1251_v15 }
 0x497   :  { %v1308_v57 = vsub.f32 %v2444_v32, %v1261_v10 }
 0x498   :  { %1335 = vst [vmem:[#allocation8 + $0x58] sm:$0xff] %v1303_v63 }
 0x499   :  { %1340 = vst [vmem:[#allocation8 + $0x80] sm:$0xff] %v1308_v57 }
 0x49b   :  { %v1787_v17 = vpop.eup %1786  ;;  %v1201_v2 = vpop.xlane.xlu2 %1200 }
 0x49c   :  { %v1257_v3 = vmul.f32 0.6931472, %v1787_v17  ;;  %1788 = vlog2.f32 %v1201_v2  ;;  %v1199_v39 = vpop.xlane.xlu1 %1198 }
 0x49d   :  { %1790 = vlog2.f32 %v1199_v39 }
 0x49e   :  { %v1306_v29 = vsub.f32 %v2454_v56, %v1257_v3 }
 0x4a0   :  { %1338 = vst [vmem:[#allocation8 + $0x70] sm:$0xff] %v1306_v29 }
 0x4a2   :  { %v1789_v40 = vpop.eup %1788 }
 0x4a3   :  { %v1791_v14 = vpop.eup %1790  ;;  %v1265_v45 = vmul.f32 0.6931472, %v1789_v40  ;;  %v1203_v26 = vpop.xlane.xlu0 %1202 }
 0x4a4   :  { %v1263_v49 = vmul.f32 0.6931472, %v1791_v14  ;;  %1792 = vlog2.f32 %v1203_v26 }
 0x4a5   :  { %v1310_v37 = vsub.f32 %v2463_v61, %v1265_v45 }
 0x4a6   :  { %v1309_v32 = vsub.f32 %v2459_v22, %v1263_v49 }
 0x4a7   :  { %1342 = vst [vmem:[#allocation8 + $0x90] sm:$0xff] %v1310_v37 }
 0x4a8   :  { %1341 = vst [vmem:[#allocation8 + $0x88] sm:$0xff] %v1309_v32 }
 0x4aa   :  { %v1793_v58 = vpop.eup %1792 }
 0x4ab   :  { %v1267_v25 = vmul.f32 0.6931472, %v1793_v58  ;;  %v1205_v46 = vpop.xlane.xlu1 %1204 }
 0x4ac   :  { %1794 = vlog2.f32 %v1205_v46 }
 0x4ad   :  { %v1311_v48 = vsub.f32 %v2469_v13, %v1267_v25 }
 0x4af   :  { %1343 = vst [vmem:[#allocation8 + $0x98] sm:$0xff] %v1311_v48 }
 0x4b2   :  { %v1795_v56 = vpop.eup %1794 }
 0x4b3   :  { %v1269_v18 = vmul.f32 0.6931472, %v1795_v56  ;;  %v1207_v62 = vpop.xlane.xlu2 %1206 }
 0x4b4   :  { %1796 = vlog2.f32 %v1207_v62 }
 0x4b5   :  { %v1312_v0 = vsub.f32 %v2474_v7, %v1269_v18 }
 0x4b7   :  { %1344 = vst [vmem:[#allocation8 + $0xa0] sm:$0xff] %v1312_v0 }
 0x4ba   :  { %v1797_v53 = vpop.eup %1796 }
 0x4bb   :  { %v1271_v61 = vmul.f32 0.6931472, %v1797_v53  ;;  %v1209_v43 = vpop.xlane.xlu0 %1208 }
 0x4bc   :  { %1798 = vlog2.f32 %v1209_v43 }
 0x4bd   :  { %v1313_v22 = vsub.f32 %v2479_v28, %v1271_v61 }
 0x4bf   :  { %1345 = vst [vmem:[#allocation8 + $0xa8] sm:$0xff] %v1313_v22 }
 0x4c2   :  { %v1799_v6 = vpop.eup %1798 }
 0x4c3   :  { %v1273_v38 = vmul.f32 0.6931472, %v1799_v6  ;;  %v1211_v30 = vpop.xlane.xlu1 %1210 }
 0x4c4   :  { %1800 = vlog2.f32 %v1211_v30 }
 0x4c5   :  { %v1314_v13 = vsub.f32 %v2484_v20, %v1273_v38 }
 0x4c7   :  { %1346 = vst [vmem:[#allocation8 + $0xb0] sm:$0xff] %v1314_v13 }
 0x4ca   :  { %v1801_v36 = vpop.eup %1800 }
 0x4cb   :  { %v1275_v60 = vmul.f32 0.6931472, %v1801_v36  ;;  %v1213_v35 = vpop.xlane.xlu2 %1212 }
 0x4cc   :  { %1802 = vlog2.f32 %v1213_v35 }
 0x4cd   :  { %v1315_v7 = vsub.f32 %v2489_v27, %v1275_v60 }
 0x4cf   :  { %1347 = vst [vmem:[#allocation8 + $0xb8] sm:$0xff] %v1315_v7 }
 0x4d2   :  { %v1803_v1 = vpop.eup %1802 }
 0x4d3   :  { %v1277_v33 = vmul.f32 0.6931472, %v1803_v1  ;;  %v1215_v9 = vpop.xlane.xlu0 %1214 }
 0x4d4   :  { %1804 = vlog2.f32 %v1215_v9 }
 0x4d5   :  { %v1316_v28 = vsub.f32 %v2494_v11, %v1277_v33 }
 0x4d7   :  { %1348 = vst [vmem:[#allocation8 + $0xc0] sm:$0xff] %v1316_v28 }
 0x4da   :  { %v1805_v55 = vpop.eup %1804 }
 0x4db   :  { %v1279_v31 = vmul.f32 0.6931472, %v1805_v55  ;;  %v1217_v54 = vpop.xlane.xlu1 %1216 }
 0x4dc   :  { %1806 = vlog2.f32 %v1217_v54 }
 0x4dd   :  { %v1317_v20 = vsub.f32 %v2499_v16, %v1279_v31 }
 0x4df   :  { %1349 = vst [vmem:[#allocation8 + $0xc8] sm:$0xff] %v1317_v20 }
 0x4e2   :  { %v1807_v5 = vpop.eup %1806 }
 0x4e3   :  { %v1281_v59 = vmul.f32 0.6931472, %v1807_v5  ;;  %v1219_v44 = vpop.xlane.xlu2 %1218 }
 0x4e4   :  { %1808 = vlog2.f32 %v1219_v44 }
 0x4e5   :  { %v1318_v27 = vsub.f32 %v2504_v4, %v1281_v59 }
 0x4e7   :  { %1350 = vst [vmem:[#allocation8 + $0xd0] sm:$0xff] %v1318_v27 }
 0x4ea   :  { %v1809_v23 = vpop.eup %1808 }
 0x4eb   :  { %v1283_v19 = vmul.f32 0.6931472, %v1809_v23  ;;  %v1221_v42 = vpop.xlane.xlu0 %1220 }
 0x4ec   :  { %1810 = vlog2.f32 %v1221_v42 }
 0x4ed   :  { %v1319_v11 = vsub.f32 %v2509_v8, %v1283_v19 }
 0x4ef   :  { %1351 = vst [vmem:[#allocation8 + $0xd8] sm:$0xff] %v1319_v11 }
 0x4f2   :  { %v1811_v41 = vpop.eup %1810 }
 0x4f3   :  { %v1285_v24 = vmul.f32 0.6931472, %v1811_v41  ;;  %v1223_v50 = vpop.xlane.xlu1 %1222 }
 0x4f4   :  { %1812 = vlog2.f32 %v1223_v50 }
 0x4f5   :  { %v1320_v16 = vsub.f32 %v2513_v52, %v1285_v24 }
 0x4f7   :  { %1352 = vst [vmem:[#allocation8 + $0xe0] sm:$0xff] %v1320_v16 }
 0x4fa   :  { %v1813_v21 = vpop.eup %1812 }
 0x4fb   :  { %v1287_v15 = vmul.f32 0.6931472, %v1813_v21  ;;  %v1225_v51 = vpop.xlane.xlu2 %1224 }
 0x4fc   :  { %1814 = vlog2.f32 %v1225_v51 }
 0x4fd   :  { %v1321_v4 = vsub.f32 %v2517_v47, %v1287_v15 }
 0x4ff   :  { %1353 = vst [vmem:[#allocation8 + $0xe8] sm:$0xff] %v1321_v4 }
 0x502   :  { %v1815_v10 = vpop.eup %1814 }
 0x503   :  { %v1289_v63 = vmul.f32 0.6931472, %v1815_v10  ;;  %v1227_v57 = vpop.xlane.xlu0 %1226 }
 0x504   :  { %1816 = vlog2.f32 %v1227_v57 }
 0x505   :  { %v1322_v8 = vsub.f32 %v2521_v12, %v1289_v63 }
 0x507   :  { %1354 = vst [vmem:[#allocation8 + $0xf0] sm:$0xff] %v1322_v8 }
 0x50a   :  { %v1817_v17 = vpop.eup %1816 }
 0x50b   :  { %v1291_v52 = vmul.f32 0.6931472, %v1817_v17 }
 0x50d   :  { %v1323_v2 = vsub.f32 %v2525_v34, %v1291_v52 }
 0x50f   :  { %1355 = vst [vmem:[#allocation8 + $0xf8] sm:$0xff] %v1323_v2 }
 0x510   :  { %1368 = dma.vmem_to_hbm [thread:$0]  %s1361_s12, 4096, %s1363_s15, [#allocation4], %s1924_s30, %s1924_s30, %s1925_s6  }
 0x511   :  { %1918 = dma.done.wait [#allocation4], 4096  }
 0x512   :  { %1919 = vsyncadd [#allocation4], 4294963200 }
 0x513   :  { %1373 = vsyncpa [#allocation3], 1 }
 0x514   :  { %1374 = vsyncpa [#allocation6], 1 }
 0x515   :  { %1375 = vsyncpa [#allocation4], 1 }

</bundles_post_ra>
